<compile_context>
chip_gen: v7x
topology: tpu7x:2x2x1
jax: 0.10.0
libtpu: 0.0.40
codegen_flags: <defaults>
</compile_context>

<pallas_src>
import functools

import jax
import jax.numpy as jnp
from jax.experimental import pallas as pl
from jax.experimental.pallas import tpu as pltpu

EPS_LN = 1e-6   # LayerNorm2d eps (NAFNet-style channel LayerNorm)


# ----------------------------- fused Pallas kernel -----------------------------

def _make_gdfn_kernel(W, TH, NB):
    """Build the fused GDFN kernel body for bands of TH rows (NB bands)."""
    TB = TH * W                 # tokens per band (output block width)
    TE2 = TB + 2 * W + 2        # band + 1-row halo each side + 2 guard columns
    multi = NB > 1

    def kernel(*refs):
        if multi:
            x_cur, x_prev, x_next = refs[:3]
            rest = refs[3:]
        else:
            x_cur = refs[0]
            x_prev = x_next = x_cur
            rest = refs[1:]
        (w1x_r, b1x_r, w1a_r, b1a_r, w1b_r, b1b_r,
         dwx_r, dbx_r, dwa_r, dba_r, dwb_r, dbb_r,
         w2_r, b2_r, w3_r, b3_r, o_ref, xext_ref) = rest

        C = x_cur.shape[1]
        s = pl.program_id(1)

        # ---------- band + 1-row halo -> zero-framed VMEM scratch ----------
        x_band = x_cur[0].astype(jnp.float32)                      # (C, TB)
        top_row = x_prev[0, :, TB - W:TB].astype(jnp.float32)      # last row of band s-1
        bot_row = x_next[0, :, 0:W].astype(jnp.float32)            # first row of band s+1
        zcol = jnp.zeros((C, 1), jnp.float32)
        xext_ref[:, 0:1] = zcol                                    # guard column (lead)
        xext_ref[:, TE2 - 1:TE2] = zcol                            # guard column (trail)
        xext_ref[:, 1:1 + W] = top_row
        xext_ref[:, 1 + W:1 + W + TB] = x_band
        xext_ref[:, 1 + W + TB:1 + W + TB + W] = bot_row
        x_ext = xext_ref[...]                                      # (C, TE2)

        # ---------- channel LayerNorm (affine folded into conv1 weights) ----------
        mu = jnp.mean(x_ext, axis=0, keepdims=True)
        var = jnp.mean((x_ext - mu) ** 2, axis=0, keepdims=True)
        xhat = (x_ext - mu) * jax.lax.rsqrt(var + EPS_LN)          # (C, TE2)

        # ---------- masks (iota-based, nothing DMA'd) ----------
        etok = jax.lax.broadcasted_iota(jnp.int32, (1, TE2), 1)
        top_halo = ((etok >= 1) & (etok < 1 + W)).astype(jnp.float32)
        bot_halo = ((etok >= 1 + W + TB) &
                    (etok < 1 + W + TB + W)).astype(jnp.float32)
        halo_scale = (1.0
                      - top_halo * (s == 0).astype(jnp.float32)
                      - bot_halo * (s == NB - 1).astype(jnp.float32))  # (1, TE2)

        otok = jax.lax.broadcasted_iota(jnp.int32, (1, TB), 1)
        ocol = (otok & (W - 1)) if (W & (W - 1)) == 0 else (otok % W)
        cm_left = (ocol != 0).astype(jnp.float32)      # dx = -1 taps invalid at col 0
        cm_right = (ocol != W - 1).astype(jnp.float32)  # dx = +1 taps invalid at col W-1

        # ---------- conv1 (1x1, per chunk group) + depthwise 3x3 ----------
        def conv1_dw(w1_r, b1_r, dw_r, db_r):
            w1g = w1_r[...].astype(jnp.float32)                    # (Cg, C)
            dwg = dw_r[...].astype(jnp.float32)                    # (Cg, 9)
            y = jnp.dot(w1g, xhat, preferred_element_type=jnp.float32) + b1_r[...]
            y = y * halo_scale                                     # zero rows outside the image
            cg = w1g.shape[0]
            acc = jnp.zeros((cg, TB), jnp.float32)
            for kx in range(3):
                part = jnp.zeros((cg, TB), jnp.float32)
                for ky in range(3):
                    off = ky * W + kx                              # static tap offset
                    tap = ky * 3 + kx
                    part = part + y[:, off:off + TB] * dwg[:, tap:tap + 1]
                if kx == 0:
                    part = part * cm_left
                elif kx == 2:
                    part = part * cm_right
                acc = acc + part
            return acc + db_r[...]

        z_x1 = conv1_dw(w1x_r, b1x_r, dwx_r, dbx_r)                # (nc,    TB)
        z_ga = conv1_dw(w1a_r, b1a_r, dwa_r, dba_r)                # (nc//2, TB)
        z_gb = conv1_dw(w1b_r, b1b_r, dwb_r, dbb_r)                # (nc//2, TB)

        # ---------- SimpleGate -> conv2 -> gate -> conv3 + residual ----------
        gate = z_ga * z_gb
        h = jnp.dot(w2_r[...].astype(jnp.float32), gate,
                    preferred_element_type=jnp.float32) + b2_r[...]
        out = jnp.dot(w3_r[...].astype(jnp.float32), z_x1 * h,
                      preferred_element_type=jnp.float32) + b3_r[...]
        o_ref[0, :, :] = (out + x_band).astype(o_ref.dtype)        # full-block lane-dense store

    return kernel


# ----------------------------- wrapper -----------------------------

def _vmem_capacity_bytes():
    default = 64 * 1024 * 1024
    try:
        info = pltpu.get_tpu_info()
    except Exception:
        return default
    for attr in ("vmem_capacity_bytes", "vmem_bytes", "vmem_size_bytes"):
        val = getattr(info, attr, None)
        if val:
            return int(val)
    return default


def _pick_band_rows(H, W, C4, C, budget_bytes):
    """Largest valid band (rows) whose per-band f32 working set fits the budget."""
    cands = [th for th in range(H, 0, -1)
             if H % th == 0 and (th == H or (th * W) % 128 == 0)]
    for th in cands:
        tb = th * W
        te2 = tb + 2 * W + 2
        est = 4 * (3 * C4 * te2 + 6 * C4 * tb + 12 * C * tb)   # rough live-set bound
        if est <= budget_bytes:
            return th
    return cands[-1]


def gdfn_pallas(x, p, band_rows=None):
    """GDFN forward. x: (B, C, H, W) NCHW float32, params from init_params."""
    B, C, H, W = x.shape
    C4 = p['w1'].shape[0]          # 2 * new_channel
    nc = p['w2'].shape[0]          # new_channel
    Ch = p['w2'].shape[1]          # new_channel // 2 (gate half)
    T = H * W

    vmem_cap = _vmem_capacity_bytes()
    if band_rows is not None:
        TH = int(band_rows)
        assert H % TH == 0 and (TH == H or (TH * W) % 128 == 0), "invalid band_rows"
    else:
        TH = _pick_band_rows(H, W, C4, C, budget_bytes=vmem_cap // 5)
    NB = H // TH
    TB = TH * W

    # Fold the LayerNorm affine into conv1: y = w1 @ (xhat*g + b) + b1
    #                                         = (w1*g^T) @ xhat + (w1 @ b + b1)
    w1f = (p['w1'] * p['ln_g'][None, :]).astype(jnp.float32)
    b1f = (p['b1'] + p['w1'] @ p['ln_b']).astype(jnp.float32)
    dwf = p['dw_w'].reshape(C4, 9).astype(jnp.float32)
    dbf = p['dw_b'].astype(jnp.float32)

    # Split conv1 / depthwise weights row-wise into the three chunk groups so the
    # kernel never does sublane-misaligned channel chunking.
    weight_args = (
        w1f[:nc],            b1f[:nc].reshape(nc, 1),
        w1f[nc:nc + Ch],     b1f[nc:nc + Ch].reshape(Ch, 1),
        w1f[nc + Ch:],       b1f[nc + Ch:].reshape(Ch, 1),
        dwf[:nc],            dbf[:nc].reshape(nc, 1),
        dwf[nc:nc + Ch],     dbf[nc:nc + Ch].reshape(Ch, 1),
        dwf[nc + Ch:],       dbf[nc + Ch:].reshape(Ch, 1),
        p['w2'].astype(jnp.float32), p['b2'].reshape(nc, 1).astype(jnp.float32),
        p['w3'].astype(jnp.float32), p['b3'].reshape(C, 1).astype(jnp.float32),
    )

    x_flat = x.reshape(B, C, T)        # free reshape: no HBM pad / strip passes
    if NB > 1:
        x_args = (x_flat, x_flat, x_flat)
        x_specs = [
            pl.BlockSpec((1, C, TB), lambda b, s: (b, 0, s)),
            pl.BlockSpec((1, C, TB), lambda b, s: (b, 0, jnp.maximum(s - 1, 0))),
            pl.BlockSpec((1, C, TB), lambda b, s: (b, 0, jnp.minimum(s + 1, NB - 1))),
        ]
    else:
        x_args = (x_flat,)
        x_specs = [pl.BlockSpec((1, C, TB), lambda b, s: (b, 0, s))]

    def _const_spec(a):
        nd = a.ndim
        return pl.BlockSpec(a.shape, lambda b, s, _n=nd: (0,) * _n)

    in_specs = x_specs + [_const_spec(a) for a in weight_args]

    out_flat = pl.pallas_call(
        _make_gdfn_kernel(W, TH, NB),
        grid=(B, NB),
        in_specs=in_specs,
        out_specs=pl.BlockSpec((1, C, TB), lambda b, s: (b, 0, s)),
        out_shape=jax.ShapeDtypeStruct((B, C, T), x.dtype),
        scratch_shapes=[pltpu.VMEM((C, TB + 2 * W + 2), jnp.float32)],
        compiler_params=pltpu.CompilerParams(
            dimension_semantics=("parallel", "parallel"),
            vmem_limit_bytes=int(vmem_cap * 3 // 4),
        ),
    )(*x_args, *weight_args)

    return out_flat.reshape(B, C, H, W)


# ----------------------------- pure-JAX reference -----------------------------

def gdfn_ref(x, p):
    B, C, H, W = x.shape
    C4 = p['w1'].shape[0]
    nc = p['w2'].shape[0]
    Ch = p['w2'].shape[1]
    hi = jax.lax.Precision.HIGHEST

    mu = jnp.mean(x, axis=1, keepdims=True)
    var = jnp.mean((x - mu) ** 2, axis=1, keepdims=True)
    y = (x - mu) * jax.lax.rsqrt(var + EPS_LN)
    y = y * p['ln_g'].reshape(1, C, 1, 1) + p['ln_b'].reshape(1, C, 1, 1)

    y = jnp.einsum('oc,bchw->bohw', p['w1'], y, precision=hi) + p['b1'].reshape(1, C4, 1, 1)
    yp = jnp.pad(y, ((0, 0), (0, 0), (1, 1), (1, 1)))
    acc = jnp.zeros_like(y)
    for ky in range(3):
        for kx in range(3):
            acc = acc + yp[:, :, ky:ky + H, kx:kx + W] * p['dw_w'][:, ky, kx].reshape(1, C4, 1, 1)
    z = acc + p['dw_b'].reshape(1, C4, 1, 1)

    x1, x2 = z[:, :nc], z[:, nc:]
    gate = x2[:, :Ch] * x2[:, Ch:]
    h = jnp.einsum('oc,bchw->bohw', p['w2'], gate, precision=hi) + p['b2'].reshape(1, nc, 1, 1)
    out = x1 * h
    out = jnp.einsum('oc,bchw->bohw', p['w3'], out, precision=hi) + p['b3'].reshape(1, C, 1, 1)
    return out + x


# ----------------------------- parameter init -----------------------------

def init_params(key, channel, gamma=2):
    nc = channel * gamma
    ks = iter(jax.random.split(key, 8))

    def conv(cin, cout):
        kw, kb = jax.random.split(next(ks))
        bound = 1.0 / (cin ** 0.5)
        w = jax.random.uniform(kw, (cout, cin), jnp.float32, -bound, bound)
        b = jax.random.uniform(kb, (cout,), jnp.float32, -bound, bound)
        return w, b

    def dw(c):
        kw, kb = jax.random.split(next(ks))
        bound = 1.0 / 3.0  # fan_in = 1 * 3 * 3
        w = jax.random.uniform(kw, (c, 3, 3), jnp.float32, -bound, bound)
        b = jax.random.uniform(kb, (c,), jnp.float32, -bound, bound)
        return w, b

    w1, b1 = conv(channel, nc * 2)      # conv1: C -> 2*new_channel
    dww, dwb = dw(nc * 2)               # depthwise 3x3 on 2*new_channel
    w2, b2 = conv(nc // 2, nc)          # conv2: new_channel//2 -> new_channel
    w3, b3 = conv(nc, channel)          # conv3: new_channel -> C
    return dict(ln_g=jnp.ones((channel,), jnp.float32),
                ln_b=jnp.zeros((channel,), jnp.float32),
                w1=w1, b1=b1, dw_w=dww, dw_b=dwb,
                w2=w2, b2=b2, w3=w3, b3=b3)


# ----------------------------- main -----------------------------

if __name__ == "__main__":
    key = jax.random.PRNGKey(0)
    k_p, k_x = jax.random.split(key)
    channel, gamma = 6, 2
    B, H, W = 2, 16, 16

    params = init_params(k_p, channel, gamma=gamma)
    x = jax.random.normal(k_x, (B, channel, H, W), jnp.float32)

    ref = gdfn_ref(x, params)

    # Single-band path (whole image per grid step).
    out = jax.block_until_ready(jax.jit(gdfn_pallas)(x, params))
    assert out.shape == (B, channel, H, W)
    assert jnp.allclose(out, ref, rtol=5e-3, atol=5e-3), \
        float(jnp.max(jnp.abs(out - ref)))

    # Multi-band path (grid over row bands; exercises the in-kernel halo).
    out_b = jax.block_until_ready(
        jax.jit(functools.partial(gdfn_pallas, band_rows=8))(x, params))
    assert jnp.allclose(out_b, ref, rtol=5e-3, atol=5e-3), \
        float(jnp.max(jnp.abs(out_b - ref)))

    print("KERNEL_OK")
</pallas_src>

<mosaic_0001>
module attributes {stable_mosaic.version = 11 : i64} {
  func.func @kernel(%arg0: i32, %arg1: i32, %arg2: memref<1x6x256xf32, #tpu.memory_space<vmem>>, %arg3: memref<12x6xf32, #tpu.memory_space<vmem>>, %arg4: memref<12x1xf32, #tpu.memory_space<vmem>>, %arg5: memref<6x6xf32, #tpu.memory_space<vmem>>, %arg6: memref<6x1xf32, #tpu.memory_space<vmem>>, %arg7: memref<6x6xf32, #tpu.memory_space<vmem>>, %arg8: memref<6x1xf32, #tpu.memory_space<vmem>>, %arg9: memref<12x9xf32, #tpu.memory_space<vmem>>, %arg10: memref<12x1xf32, #tpu.memory_space<vmem>>, %arg11: memref<6x9xf32, #tpu.memory_space<vmem>>, %arg12: memref<6x1xf32, #tpu.memory_space<vmem>>, %arg13: memref<6x9xf32, #tpu.memory_space<vmem>>, %arg14: memref<6x1xf32, #tpu.memory_space<vmem>>, %arg15: memref<12x6xf32, #tpu.memory_space<vmem>>, %arg16: memref<12x1xf32, #tpu.memory_space<vmem>>, %arg17: memref<6x12xf32, #tpu.memory_space<vmem>>, %arg18: memref<6x1xf32, #tpu.memory_space<vmem>>, %arg19: memref<1x6x256xf32, #tpu.memory_space<vmem>>, %arg20: memref<6x290xf32, #tpu.memory_space<vmem>>) attributes {dimension_semantics = [#tpu.dimension_semantics<parallel>, #tpu.dimension_semantics<parallel>], iteration_bounds = array<i64: 2, 1>, scalar_prefetch = 0 : i64, scratch_operands = 1 : i64, tpu.core_type = #tpu.core_type<tc>, window_params = [{transform_indices = @transform_0, window_bounds = array<i64: 1, 6, 256>}, {pipeline_mode = #tpu.pipeline_mode<synchronous>, transform_indices = @transform_1, window_bounds = array<i64: 12, 6>}, {pipeline_mode = #tpu.pipeline_mode<synchronous>, transform_indices = @transform_2, window_bounds = array<i64: 12, 1>}, {pipeline_mode = #tpu.pipeline_mode<synchronous>, transform_indices = @transform_3, window_bounds = array<i64: 6, 6>}, {pipeline_mode = #tpu.pipeline_mode<synchronous>, transform_indices = @transform_4, window_bounds = array<i64: 6, 1>}, {pipeline_mode = #tpu.pipeline_mode<synchronous>, transform_indices = @transform_5, window_bounds = array<i64: 6, 6>}, {pipeline_mode = #tpu.pipeline_mode<synchronous>, transform_indices = @transform_6, window_bounds = array<i64: 6, 1>}, {pipeline_mode = #tpu.pipeline_mode<synchronous>, transform_indices = @transform_7, window_bounds = array<i64: 12, 9>}, {pipeline_mode = #tpu.pipeline_mode<synchronous>, transform_indices = @transform_8, window_bounds = array<i64: 12, 1>}, {pipeline_mode = #tpu.pipeline_mode<synchronous>, transform_indices = @transform_9, window_bounds = array<i64: 6, 9>}, {pipeline_mode = #tpu.pipeline_mode<synchronous>, transform_indices = @transform_10, window_bounds = array<i64: 6, 1>}, {pipeline_mode = #tpu.pipeline_mode<synchronous>, transform_indices = @transform_11, window_bounds = array<i64: 6, 9>}, {pipeline_mode = #tpu.pipeline_mode<synchronous>, transform_indices = @transform_12, window_bounds = array<i64: 6, 1>}, {pipeline_mode = #tpu.pipeline_mode<synchronous>, transform_indices = @transform_13, window_bounds = array<i64: 12, 6>}, {pipeline_mode = #tpu.pipeline_mode<synchronous>, transform_indices = @transform_14, window_bounds = array<i64: 12, 1>}, {pipeline_mode = #tpu.pipeline_mode<synchronous>, transform_indices = @transform_15, window_bounds = array<i64: 6, 12>}, {pipeline_mode = #tpu.pipeline_mode<synchronous>, transform_indices = @transform_16, window_bounds = array<i64: 6, 1>}, {transform_indices = @transform_17, window_bounds = array<i64: 1, 6, 256>}]} {
    %c0 = arith.constant 0 : index
    %c0_0 = arith.constant 0 : index
    %c0_1 = arith.constant 0 : index
    %0 = vector.load %arg2[%c0, %c0_0, %c0_1] : memref<1x6x256xf32, #tpu.memory_space<vmem>>, vector<1x6x256xf32>
    %1 = vector.shape_cast %0 : vector<1x6x256xf32> to vector<6x256xf32>
    %c0_2 = arith.constant 0 : index
    %c0_3 = arith.constant 0 : index
    %c240 = arith.constant 240 : index
    %2 = vector.load %arg2[%c0_2, %c0_3, %c240] : memref<1x6x256xf32, #tpu.memory_space<vmem>>, vector<1x6x16xf32>
    %3 = vector.shape_cast %2 : vector<1x6x16xf32> to vector<6x16xf32>
    %c0_4 = arith.constant 0 : index
    %c0_5 = arith.constant 0 : index
    %c0_6 = arith.constant 0 : index
    %4 = vector.load %arg2[%c0_4, %c0_5, %c0_6] : memref<1x6x256xf32, #tpu.memory_space<vmem>>, vector<1x6x16xf32>
    %5 = vector.shape_cast %4 : vector<1x6x16xf32> to vector<6x16xf32>
    %cst = arith.constant 0.000000e+00 : f32
    %6 = vector.broadcast %cst : f32 to vector<6x1xf32>
    %c0_7 = arith.constant 0 : index
    %c0_8 = arith.constant 0 : index
    %7 = vector.load %arg20[%c0_7, %c0_8] : memref<6x290xf32, #tpu.memory_space<vmem>>, vector<6x1xf32>
    tpu.vector_store %arg20[%c0_7, %c0_8], %6 {strides = array<i32>} : memref<6x290xf32, #tpu.memory_space<vmem>>, vector<6x1xf32>,
    %c0_9 = arith.constant 0 : index
    %c289 = arith.constant 289 : index
    %8 = vector.load %arg20[%c0_9, %c289] : memref<6x290xf32, #tpu.memory_space<vmem>>, vector<6x1xf32>
    tpu.vector_store %arg20[%c0_9, %c289], %6 {strides = array<i32>} : memref<6x290xf32, #tpu.memory_space<vmem>>, vector<6x1xf32>,
    %c0_10 = arith.constant 0 : index
    %c1 = arith.constant 1 : index
    %9 = vector.load %arg20[%c0_10, %c1] : memref<6x290xf32, #tpu.memory_space<vmem>>, vector<6x16xf32>
    tpu.vector_store %arg20[%c0_10, %c1], %3 {strides = array<i32>} : memref<6x290xf32, #tpu.memory_space<vmem>>, vector<6x16xf32>,
    %c0_11 = arith.constant 0 : index
    %c17 = arith.constant 17 : index
    %10 = vector.load %arg20[%c0_11, %c17] : memref<6x290xf32, #tpu.memory_space<vmem>>, vector<6x256xf32>
    tpu.vector_store %arg20[%c0_11, %c17], %1 {strides = array<i32>} : memref<6x290xf32, #tpu.memory_space<vmem>>, vector<6x256xf32>,
    %c0_12 = arith.constant 0 : index
    %c273 = arith.constant 273 : index
    %11 = vector.load %arg20[%c0_12, %c273] : memref<6x290xf32, #tpu.memory_space<vmem>>, vector<6x16xf32>
    tpu.vector_store %arg20[%c0_12, %c273], %5 {strides = array<i32>} : memref<6x290xf32, #tpu.memory_space<vmem>>, vector<6x16xf32>,
    %c0_13 = arith.constant 0 : index
    %c0_14 = arith.constant 0 : index
    %12 = vector.load %arg20[%c0_13, %c0_14] : memref<6x290xf32, #tpu.memory_space<vmem>>, vector<6x290xf32>
    %cst_15 = arith.constant dense<0.000000e+00> : vector<290xf32>
    %13 = vector.multi_reduction <add>, %12, %cst_15 [0] : vector<6x290xf32> to vector<290xf32>
    %14 = vector.shape_cast %13 : vector<290xf32> to vector<1x290xf32>
    %cst_16 = arith.constant 6.000000e+00 : f32
    %15 = vector.broadcast %cst_16 : f32 to vector<1x290xf32>
    %16 = arith.divf %14, %15 : vector<1x290xf32>
    %17 = vector.broadcast %16 : vector<1x290xf32> to vector<6x290xf32>
    %18 = arith.subf %12, %17 : vector<6x290xf32>
    %19 = arith.mulf %18, %18 : vector<6x290xf32>
    %cst_17 = arith.constant dense<0.000000e+00> : vector<290xf32>
    %20 = vector.multi_reduction <add>, %19, %cst_17 [0] : vector<6x290xf32> to vector<290xf32>
    %21 = vector.shape_cast %20 : vector<290xf32> to vector<1x290xf32>
    %cst_18 = arith.constant 6.000000e+00 : f32
    %22 = vector.broadcast %cst_18 : f32 to vector<1x290xf32>
    %23 = arith.divf %21, %22 : vector<1x290xf32>
    %24 = vector.broadcast %16 : vector<1x290xf32> to vector<6x290xf32>
    %25 = arith.subf %12, %24 : vector<6x290xf32>
    %cst_19 = arith.constant 9.99999997E-7 : f32
    %26 = vector.broadcast %cst_19 : f32 to vector<1x290xf32>
    %27 = arith.addf %23, %26 : vector<1x290xf32>
    %28 = math.rsqrt %27 : vector<1x290xf32>
    %29 = vector.broadcast %28 : vector<1x290xf32> to vector<6x290xf32>
    %30 = arith.mulf %25, %29 : vector<6x290xf32>
    %31 = tpu.iota {dimensions = array<i32: 1>} : vector<1x290xi32>
    %c1_i32 = arith.constant 1 : i32
    %32 = vector.broadcast %c1_i32 : i32 to vector<1x290xi32>
    %33 = arith.cmpi sge, %31, %32 : vector<1x290xi32>
    %c17_i32 = arith.constant 17 : i32
    %34 = vector.broadcast %c17_i32 : i32 to vector<1x290xi32>
    %35 = arith.cmpi slt, %31, %34 : vector<1x290xi32>
    %36 = arith.andi %33, %35 : vector<1x290xi1>
    %37 = arith.extui %36 : vector<1x290xi1> to vector<1x290xi32>
    %38 = arith.sitofp %37 : vector<1x290xi32> to vector<1x290xf32>
    %c273_i32 = arith.constant 273 : i32
    %39 = vector.broadcast %c273_i32 : i32 to vector<1x290xi32>
    %40 = arith.cmpi sge, %31, %39 : vector<1x290xi32>
    %c289_i32 = arith.constant 289 : i32
    %41 = vector.broadcast %c289_i32 : i32 to vector<1x290xi32>
    %42 = arith.cmpi slt, %31, %41 : vector<1x290xi32>
    %43 = arith.andi %40, %42 : vector<1x290xi1>
    %44 = arith.extui %43 : vector<1x290xi1> to vector<1x290xi32>
    %45 = arith.sitofp %44 : vector<1x290xi32> to vector<1x290xf32>
    %c0_i32 = arith.constant 0 : i32
    %46 = arith.cmpi eq, %arg1, %c0_i32 : i32
    %47 = arith.extui %46 : i1 to i32
    %48 = arith.sitofp %47 : i32 to f32
    %49 = vector.broadcast %48 : f32 to vector<1x290xf32>
    %50 = arith.mulf %38, %49 : vector<1x290xf32>
    %cst_20 = arith.constant 1.000000e+00 : f32
    %51 = vector.broadcast %cst_20 : f32 to vector<1x290xf32>
    %52 = arith.subf %51, %50 : vector<1x290xf32>
    %c0_i32_21 = arith.constant 0 : i32
    %53 = arith.cmpi eq, %arg1, %c0_i32_21 : i32
    %54 = arith.extui %53 : i1 to i32
    %55 = arith.sitofp %54 : i32 to f32
    %56 = vector.broadcast %55 : f32 to vector<1x290xf32>
    %57 = arith.mulf %45, %56 : vector<1x290xf32>
    %58 = arith.subf %52, %57 : vector<1x290xf32>
    %59 = tpu.iota {dimensions = array<i32: 1>} : vector<1x256xi32>
    %c15_i32 = arith.constant 15 : i32
    %60 = vector.broadcast %c15_i32 : i32 to vector<1x256xi32>
    %61 = arith.andi %59, %60 : vector<1x256xi32>
    %c0_i32_22 = arith.constant 0 : i32
    %62 = vector.broadcast %c0_i32_22 : i32 to vector<1x256xi32>
    %63 = arith.cmpi ne, %61, %62 : vector<1x256xi32>
    %64 = arith.extui %63 : vector<1x256xi1> to vector<1x256xi32>
    %65 = arith.sitofp %64 : vector<1x256xi32> to vector<1x256xf32>
    %c15_i32_23 = arith.constant 15 : i32
    %66 = vector.broadcast %c15_i32_23 : i32 to vector<1x256xi32>
    %67 = arith.cmpi ne, %61, %66 : vector<1x256xi32>
    %68 = arith.extui %67 : vector<1x256xi1> to vector<1x256xi32>
    %69 = arith.sitofp %68 : vector<1x256xi32> to vector<1x256xf32>
    %c0_24 = arith.constant 0 : index
    %c0_25 = arith.constant 0 : index
    %70 = vector.load %arg3[%c0_24, %c0_25] : memref<12x6xf32, #tpu.memory_space<vmem>>, vector<12x6xf32>
    %c0_26 = arith.constant 0 : index
    %c0_27 = arith.constant 0 : index
    %71 = vector.load %arg9[%c0_26, %c0_27] : memref<12x9xf32, #tpu.memory_space<vmem>>, vector<12x9xf32>
    %cst_28 = arith.constant dense<0.000000e+00> : vector<12x290xf32>
    %72 = tpu.matmul %70, %30, %cst_28 {dimension_numbers = #tpu.dot_dimension_numbers<[1], [0], [0], [1], [0, 0, 1, 1], [], []>} : vector<12x6xf32>, vector<6x290xf32>, vector<12x290xf32> -> vector<12x290xf32>
    %c0_29 = arith.constant 0 : index
    %c0_30 = arith.constant 0 : index
    %73 = vector.load %arg4[%c0_29, %c0_30] : memref<12x1xf32, #tpu.memory_space<vmem>>, vector<12x1xf32>
    %74 = vector.broadcast %73 : vector<12x1xf32> to vector<12x290xf32>
    %75 = arith.addf %72, %74 : vector<12x290xf32>
    %76 = vector.broadcast %58 : vector<1x290xf32> to vector<12x290xf32>
    %77 = arith.mulf %75, %76 : vector<12x290xf32>
    %cst_31 = arith.constant 0.000000e+00 : f32
    %78 = vector.broadcast %cst_31 : f32 to vector<12x256xf32>
    %cst_32 = arith.constant 0.000000e+00 : f32
    %79 = vector.broadcast %cst_32 : f32 to vector<12x256xf32>
    %80 = vector.extract_strided_slice %77 {offsets = [0, 0], sizes = [12, 256], strides = [1, 1]} : vector<12x290xf32> to vector<12x256xf32>
    %81 = vector.extract_strided_slice %71 {offsets = [0, 0], sizes = [12, 1], strides = [1, 1]} : vector<12x9xf32> to vector<12x1xf32>
    %82 = vector.broadcast %81 : vector<12x1xf32> to vector<12x256xf32>
    %83 = arith.mulf %80, %82 : vector<12x256xf32>
    %84 = arith.addf %79, %83 : vector<12x256xf32>
    %85 = vector.extract_strided_slice %77 {offsets = [0, 16], sizes = [12, 256], strides = [1, 1]} : vector<12x290xf32> to vector<12x256xf32>
    %86 = vector.extract_strided_slice %71 {offsets = [0, 3], sizes = [12, 1], strides = [1, 1]} : vector<12x9xf32> to vector<12x1xf32>
    %87 = vector.broadcast %86 : vector<12x1xf32> to vector<12x256xf32>
    %88 = arith.mulf %85, %87 : vector<12x256xf32>
    %89 = arith.addf %84, %88 : vector<12x256xf32>
    %90 = vector.extract_strided_slice %77 {offsets = [0, 32], sizes = [12, 256], strides = [1, 1]} : vector<12x290xf32> to vector<12x256xf32>
    %91 = vector.extract_strided_slice %71 {offsets = [0, 6], sizes = [12, 1], strides = [1, 1]} : vector<12x9xf32> to vector<12x1xf32>
    %92 = vector.broadcast %91 : vector<12x1xf32> to vector<12x256xf32>
    %93 = arith.mulf %90, %92 : vector<12x256xf32>
    %94 = arith.addf %89, %93 : vector<12x256xf32>
    %95 = vector.broadcast %65 : vector<1x256xf32> to vector<12x256xf32>
    %96 = arith.mulf %94, %95 : vector<12x256xf32>
    %97 = arith.addf %78, %96 : vector<12x256xf32>
    %cst_33 = arith.constant 0.000000e+00 : f32
    %98 = vector.broadcast %cst_33 : f32 to vector<12x256xf32>
    %99 = vector.extract_strided_slice %77 {offsets = [0, 1], sizes = [12, 256], strides = [1, 1]} : vector<12x290xf32> to vector<12x256xf32>
    %100 = vector.extract_strided_slice %71 {offsets = [0, 1], sizes = [12, 1], strides = [1, 1]} : vector<12x9xf32> to vector<12x1xf32>
    %101 = vector.broadcast %100 : vector<12x1xf32> to vector<12x256xf32>
    %102 = arith.mulf %99, %101 : vector<12x256xf32>
    %103 = arith.addf %98, %102 : vector<12x256xf32>
    %104 = vector.extract_strided_slice %77 {offsets = [0, 17], sizes = [12, 256], strides = [1, 1]} : vector<12x290xf32> to vector<12x256xf32>
    %105 = vector.extract_strided_slice %71 {offsets = [0, 4], sizes = [12, 1], strides = [1, 1]} : vector<12x9xf32> to vector<12x1xf32>
    %106 = vector.broadcast %105 : vector<12x1xf32> to vector<12x256xf32>
    %107 = arith.mulf %104, %106 : vector<12x256xf32>
    %108 = arith.addf %103, %107 : vector<12x256xf32>
    %109 = vector.extract_strided_slice %77 {offsets = [0, 33], sizes = [12, 256], strides = [1, 1]} : vector<12x290xf32> to vector<12x256xf32>
    %110 = vector.extract_strided_slice %71 {offsets = [0, 7], sizes = [12, 1], strides = [1, 1]} : vector<12x9xf32> to vector<12x1xf32>
    %111 = vector.broadcast %110 : vector<12x1xf32> to vector<12x256xf32>
    %112 = arith.mulf %109, %111 : vector<12x256xf32>
    %113 = arith.addf %108, %112 : vector<12x256xf32>
    %114 = arith.addf %97, %113 : vector<12x256xf32>
    %cst_34 = arith.constant 0.000000e+00 : f32
    %115 = vector.broadcast %cst_34 : f32 to vector<12x256xf32>
    %116 = vector.extract_strided_slice %77 {offsets = [0, 2], sizes = [12, 256], strides = [1, 1]} : vector<12x290xf32> to vector<12x256xf32>
    %117 = vector.extract_strided_slice %71 {offsets = [0, 2], sizes = [12, 1], strides = [1, 1]} : vector<12x9xf32> to vector<12x1xf32>
    %118 = vector.broadcast %117 : vector<12x1xf32> to vector<12x256xf32>
    %119 = arith.mulf %116, %118 : vector<12x256xf32>
    %120 = arith.addf %115, %119 : vector<12x256xf32>
    %121 = vector.extract_strided_slice %77 {offsets = [0, 18], sizes = [12, 256], strides = [1, 1]} : vector<12x290xf32> to vector<12x256xf32>
    %122 = vector.extract_strided_slice %71 {offsets = [0, 5], sizes = [12, 1], strides = [1, 1]} : vector<12x9xf32> to vector<12x1xf32>
    %123 = vector.broadcast %122 : vector<12x1xf32> to vector<12x256xf32>
    %124 = arith.mulf %121, %123 : vector<12x256xf32>
    %125 = arith.addf %120, %124 : vector<12x256xf32>
    %126 = vector.extract_strided_slice %77 {offsets = [0, 34], sizes = [12, 256], strides = [1, 1]} : vector<12x290xf32> to vector<12x256xf32>
    %127 = vector.extract_strided_slice %71 {offsets = [0, 8], sizes = [12, 1], strides = [1, 1]} : vector<12x9xf32> to vector<12x1xf32>
    %128 = vector.broadcast %127 : vector<12x1xf32> to vector<12x256xf32>
    %129 = arith.mulf %126, %128 : vector<12x256xf32>
    %130 = arith.addf %125, %129 : vector<12x256xf32>
    %131 = vector.broadcast %69 : vector<1x256xf32> to vector<12x256xf32>
    %132 = arith.mulf %130, %131 : vector<12x256xf32>
    %133 = arith.addf %114, %132 : vector<12x256xf32>
    %c0_35 = arith.constant 0 : index
    %c0_36 = arith.constant 0 : index
    %134 = vector.load %arg10[%c0_35, %c0_36] : memref<12x1xf32, #tpu.memory_space<vmem>>, vector<12x1xf32>
    %135 = vector.broadcast %134 : vector<12x1xf32> to vector<12x256xf32>
    %136 = arith.addf %133, %135 : vector<12x256xf32>
    %c0_37 = arith.constant 0 : index
    %c0_38 = arith.constant 0 : index
    %137 = vector.load %arg5[%c0_37, %c0_38] : memref<6x6xf32, #tpu.memory_space<vmem>>, vector<6x6xf32>
    %c0_39 = arith.constant 0 : index
    %c0_40 = arith.constant 0 : index
    %138 = vector.load %arg11[%c0_39, %c0_40] : memref<6x9xf32, #tpu.memory_space<vmem>>, vector<6x9xf32>
    %cst_41 = arith.constant dense<0.000000e+00> : vector<6x290xf32>
    %139 = tpu.matmul %137, %30, %cst_41 {dimension_numbers = #tpu.dot_dimension_numbers<[1], [0], [0], [1], [0, 0, 1, 1], [], []>} : vector<6x6xf32>, vector<6x290xf32>, vector<6x290xf32> -> vector<6x290xf32>
    %c0_42 = arith.constant 0 : index
    %c0_43 = arith.constant 0 : index
    %140 = vector.load %arg6[%c0_42, %c0_43] : memref<6x1xf32, #tpu.memory_space<vmem>>, vector<6x1xf32>
    %141 = vector.broadcast %140 : vector<6x1xf32> to vector<6x290xf32>
    %142 = arith.addf %139, %141 : vector<6x290xf32>
    %143 = vector.broadcast %58 : vector<1x290xf32> to vector<6x290xf32>
    %144 = arith.mulf %142, %143 : vector<6x290xf32>
    %cst_44 = arith.constant 0.000000e+00 : f32
    %145 = vector.broadcast %cst_44 : f32 to vector<6x256xf32>
    %cst_45 = arith.constant 0.000000e+00 : f32
    %146 = vector.broadcast %cst_45 : f32 to vector<6x256xf32>
    %147 = vector.extract_strided_slice %144 {offsets = [0, 0], sizes = [6, 256], strides = [1, 1]} : vector<6x290xf32> to vector<6x256xf32>
    %148 = vector.extract_strided_slice %138 {offsets = [0, 0], sizes = [6, 1], strides = [1, 1]} : vector<6x9xf32> to vector<6x1xf32>
    %149 = vector.broadcast %148 : vector<6x1xf32> to vector<6x256xf32>
    %150 = arith.mulf %147, %149 : vector<6x256xf32>
    %151 = arith.addf %146, %150 : vector<6x256xf32>
    %152 = vector.extract_strided_slice %144 {offsets = [0, 16], sizes = [6, 256], strides = [1, 1]} : vector<6x290xf32> to vector<6x256xf32>
    %153 = vector.extract_strided_slice %138 {offsets = [0, 3], sizes = [6, 1], strides = [1, 1]} : vector<6x9xf32> to vector<6x1xf32>
    %154 = vector.broadcast %153 : vector<6x1xf32> to vector<6x256xf32>
    %155 = arith.mulf %152, %154 : vector<6x256xf32>
    %156 = arith.addf %151, %155 : vector<6x256xf32>
    %157 = vector.extract_strided_slice %144 {offsets = [0, 32], sizes = [6, 256], strides = [1, 1]} : vector<6x290xf32> to vector<6x256xf32>
    %158 = vector.extract_strided_slice %138 {offsets = [0, 6], sizes = [6, 1], strides = [1, 1]} : vector<6x9xf32> to vector<6x1xf32>
    %159 = vector.broadcast %158 : vector<6x1xf32> to vector<6x256xf32>
    %160 = arith.mulf %157, %159 : vector<6x256xf32>
    %161 = arith.addf %156, %160 : vector<6x256xf32>
    %162 = vector.broadcast %65 : vector<1x256xf32> to vector<6x256xf32>
    %163 = arith.mulf %161, %162 : vector<6x256xf32>
    %164 = arith.addf %145, %163 : vector<6x256xf32>
    %cst_46 = arith.constant 0.000000e+00 : f32
    %165 = vector.broadcast %cst_46 : f32 to vector<6x256xf32>
    %166 = vector.extract_strided_slice %144 {offsets = [0, 1], sizes = [6, 256], strides = [1, 1]} : vector<6x290xf32> to vector<6x256xf32>
    %167 = vector.extract_strided_slice %138 {offsets = [0, 1], sizes = [6, 1], strides = [1, 1]} : vector<6x9xf32> to vector<6x1xf32>
    %168 = vector.broadcast %167 : vector<6x1xf32> to vector<6x256xf32>
    %169 = arith.mulf %166, %168 : vector<6x256xf32>
    %170 = arith.addf %165, %169 : vector<6x256xf32>
    %171 = vector.extract_strided_slice %144 {offsets = [0, 17], sizes = [6, 256], strides = [1, 1]} : vector<6x290xf32> to vector<6x256xf32>
    %172 = vector.extract_strided_slice %138 {offsets = [0, 4], sizes = [6, 1], strides = [1, 1]} : vector<6x9xf32> to vector<6x1xf32>
    %173 = vector.broadcast %172 : vector<6x1xf32> to vector<6x256xf32>
    %174 = arith.mulf %171, %173 : vector<6x256xf32>
    %175 = arith.addf %170, %174 : vector<6x256xf32>
    %176 = vector.extract_strided_slice %144 {offsets = [0, 33], sizes = [6, 256], strides = [1, 1]} : vector<6x290xf32> to vector<6x256xf32>
    %177 = vector.extract_strided_slice %138 {offsets = [0, 7], sizes = [6, 1], strides = [1, 1]} : vector<6x9xf32> to vector<6x1xf32>
    %178 = vector.broadcast %177 : vector<6x1xf32> to vector<6x256xf32>
    %179 = arith.mulf %176, %178 : vector<6x256xf32>
    %180 = arith.addf %175, %179 : vector<6x256xf32>
    %181 = arith.addf %164, %180 : vector<6x256xf32>
    %cst_47 = arith.constant 0.000000e+00 : f32
    %182 = vector.broadcast %cst_47 : f32 to vector<6x256xf32>
    %183 = vector.extract_strided_slice %144 {offsets = [0, 2], sizes = [6, 256], strides = [1, 1]} : vector<6x290xf32> to vector<6x256xf32>
    %184 = vector.extract_strided_slice %138 {offsets = [0, 2], sizes = [6, 1], strides = [1, 1]} : vector<6x9xf32> to vector<6x1xf32>
    %185 = vector.broadcast %184 : vector<6x1xf32> to vector<6x256xf32>
    %186 = arith.mulf %183, %185 : vector<6x256xf32>
    %187 = arith.addf %182, %186 : vector<6x256xf32>
    %188 = vector.extract_strided_slice %144 {offsets = [0, 18], sizes = [6, 256], strides = [1, 1]} : vector<6x290xf32> to vector<6x256xf32>
    %189 = vector.extract_strided_slice %138 {offsets = [0, 5], sizes = [6, 1], strides = [1, 1]} : vector<6x9xf32> to vector<6x1xf32>
    %190 = vector.broadcast %189 : vector<6x1xf32> to vector<6x256xf32>
    %191 = arith.mulf %188, %190 : vector<6x256xf32>
    %192 = arith.addf %187, %191 : vector<6x256xf32>
    %193 = vector.extract_strided_slice %144 {offsets = [0, 34], sizes = [6, 256], strides = [1, 1]} : vector<6x290xf32> to vector<6x256xf32>
    %194 = vector.extract_strided_slice %138 {offsets = [0, 8], sizes = [6, 1], strides = [1, 1]} : vector<6x9xf32> to vector<6x1xf32>
    %195 = vector.broadcast %194 : vector<6x1xf32> to vector<6x256xf32>
    %196 = arith.mulf %193, %195 : vector<6x256xf32>
    %197 = arith.addf %192, %196 : vector<6x256xf32>
    %198 = vector.broadcast %69 : vector<1x256xf32> to vector<6x256xf32>
    %199 = arith.mulf %197, %198 : vector<6x256xf32>
    %200 = arith.addf %181, %199 : vector<6x256xf32>
    %c0_48 = arith.constant 0 : index
    %c0_49 = arith.constant 0 : index
    %201 = vector.load %arg12[%c0_48, %c0_49] : memref<6x1xf32, #tpu.memory_space<vmem>>, vector<6x1xf32>
    %202 = vector.broadcast %201 : vector<6x1xf32> to vector<6x256xf32>
    %203 = arith.addf %200, %202 : vector<6x256xf32>
    %c0_50 = arith.constant 0 : index
    %c0_51 = arith.constant 0 : index
    %204 = vector.load %arg7[%c0_50, %c0_51] : memref<6x6xf32, #tpu.memory_space<vmem>>, vector<6x6xf32>
    %c0_52 = arith.constant 0 : index
    %c0_53 = arith.constant 0 : index
    %205 = vector.load %arg13[%c0_52, %c0_53] : memref<6x9xf32, #tpu.memory_space<vmem>>, vector<6x9xf32>
    %cst_54 = arith.constant dense<0.000000e+00> : vector<6x290xf32>
    %206 = tpu.matmul %204, %30, %cst_54 {dimension_numbers = #tpu.dot_dimension_numbers<[1], [0], [0], [1], [0, 0, 1, 1], [], []>} : vector<6x6xf32>, vector<6x290xf32>, vector<6x290xf32> -> vector<6x290xf32>
    %c0_55 = arith.constant 0 : index
    %c0_56 = arith.constant 0 : index
    %207 = vector.load %arg8[%c0_55, %c0_56] : memref<6x1xf32, #tpu.memory_space<vmem>>, vector<6x1xf32>
    %208 = vector.broadcast %207 : vector<6x1xf32> to vector<6x290xf32>
    %209 = arith.addf %206, %208 : vector<6x290xf32>
    %210 = vector.broadcast %58 : vector<1x290xf32> to vector<6x290xf32>
    %211 = arith.mulf %209, %210 : vector<6x290xf32>
    %cst_57 = arith.constant 0.000000e+00 : f32
    %212 = vector.broadcast %cst_57 : f32 to vector<6x256xf32>
    %cst_58 = arith.constant 0.000000e+00 : f32
    %213 = vector.broadcast %cst_58 : f32 to vector<6x256xf32>
    %214 = vector.extract_strided_slice %211 {offsets = [0, 0], sizes = [6, 256], strides = [1, 1]} : vector<6x290xf32> to vector<6x256xf32>
    %215 = vector.extract_strided_slice %205 {offsets = [0, 0], sizes = [6, 1], strides = [1, 1]} : vector<6x9xf32> to vector<6x1xf32>
    %216 = vector.broadcast %215 : vector<6x1xf32> to vector<6x256xf32>
    %217 = arith.mulf %214, %216 : vector<6x256xf32>
    %218 = arith.addf %213, %217 : vector<6x256xf32>
    %219 = vector.extract_strided_slice %211 {offsets = [0, 16], sizes = [6, 256], strides = [1, 1]} : vector<6x290xf32> to vector<6x256xf32>
    %220 = vector.extract_strided_slice %205 {offsets = [0, 3], sizes = [6, 1], strides = [1, 1]} : vector<6x9xf32> to vector<6x1xf32>
    %221 = vector.broadcast %220 : vector<6x1xf32> to vector<6x256xf32>
    %222 = arith.mulf %219, %221 : vector<6x256xf32>
    %223 = arith.addf %218, %222 : vector<6x256xf32>
    %224 = vector.extract_strided_slice %211 {offsets = [0, 32], sizes = [6, 256], strides = [1, 1]} : vector<6x290xf32> to vector<6x256xf32>
    %225 = vector.extract_strided_slice %205 {offsets = [0, 6], sizes = [6, 1], strides = [1, 1]} : vector<6x9xf32> to vector<6x1xf32>
    %226 = vector.broadcast %225 : vector<6x1xf32> to vector<6x256xf32>
    %227 = arith.mulf %224, %226 : vector<6x256xf32>
    %228 = arith.addf %223, %227 : vector<6x256xf32>
    %229 = vector.broadcast %65 : vector<1x256xf32> to vector<6x256xf32>
    %230 = arith.mulf %228, %229 : vector<6x256xf32>
    %231 = arith.addf %212, %230 : vector<6x256xf32>
    %cst_59 = arith.constant 0.000000e+00 : f32
    %232 = vector.broadcast %cst_59 : f32 to vector<6x256xf32>
    %233 = vector.extract_strided_slice %211 {offsets = [0, 1], sizes = [6, 256], strides = [1, 1]} : vector<6x290xf32> to vector<6x256xf32>
    %234 = vector.extract_strided_slice %205 {offsets = [0, 1], sizes = [6, 1], strides = [1, 1]} : vector<6x9xf32> to vector<6x1xf32>
    %235 = vector.broadcast %234 : vector<6x1xf32> to vector<6x256xf32>
    %236 = arith.mulf %233, %235 : vector<6x256xf32>
    %237 = arith.addf %232, %236 : vector<6x256xf32>
    %238 = vector.extract_strided_slice %211 {offsets = [0, 17], sizes = [6, 256], strides = [1, 1]} : vector<6x290xf32> to vector<6x256xf32>
    %239 = vector.extract_strided_slice %205 {offsets = [0, 4], sizes = [6, 1], strides = [1, 1]} : vector<6x9xf32> to vector<6x1xf32>
    %240 = vector.broadcast %239 : vector<6x1xf32> to vector<6x256xf32>
    %241 = arith.mulf %238, %240 : vector<6x256xf32>
    %242 = arith.addf %237, %241 : vector<6x256xf32>
    %243 = vector.extract_strided_slice %211 {offsets = [0, 33], sizes = [6, 256], strides = [1, 1]} : vector<6x290xf32> to vector<6x256xf32>
    %244 = vector.extract_strided_slice %205 {offsets = [0, 7], sizes = [6, 1], strides = [1, 1]} : vector<6x9xf32> to vector<6x1xf32>
    %245 = vector.broadcast %244 : vector<6x1xf32> to vector<6x256xf32>
    %246 = arith.mulf %243, %245 : vector<6x256xf32>
    %247 = arith.addf %242, %246 : vector<6x256xf32>
    %248 = arith.addf %231, %247 : vector<6x256xf32>
    %cst_60 = arith.constant 0.000000e+00 : f32
    %249 = vector.broadcast %cst_60 : f32 to vector<6x256xf32>
    %250 = vector.extract_strided_slice %211 {offsets = [0, 2], sizes = [6, 256], strides = [1, 1]} : vector<6x290xf32> to vector<6x256xf32>
    %251 = vector.extract_strided_slice %205 {offsets = [0, 2], sizes = [6, 1], strides = [1, 1]} : vector<6x9xf32> to vector<6x1xf32>
    %252 = vector.broadcast %251 : vector<6x1xf32> to vector<6x256xf32>
    %253 = arith.mulf %250, %252 : vector<6x256xf32>
    %254 = arith.addf %249, %253 : vector<6x256xf32>
    %255 = vector.extract_strided_slice %211 {offsets = [0, 18], sizes = [6, 256], strides = [1, 1]} : vector<6x290xf32> to vector<6x256xf32>
    %256 = vector.extract_strided_slice %205 {offsets = [0, 5], sizes = [6, 1], strides = [1, 1]} : vector<6x9xf32> to vector<6x1xf32>
    %257 = vector.broadcast %256 : vector<6x1xf32> to vector<6x256xf32>
    %258 = arith.mulf %255, %257 : vector<6x256xf32>
    %259 = arith.addf %254, %258 : vector<6x256xf32>
    %260 = vector.extract_strided_slice %211 {offsets = [0, 34], sizes = [6, 256], strides = [1, 1]} : vector<6x290xf32> to vector<6x256xf32>
    %261 = vector.extract_strided_slice %205 {offsets = [0, 8], sizes = [6, 1], strides = [1, 1]} : vector<6x9xf32> to vector<6x1xf32>
    %262 = vector.broadcast %261 : vector<6x1xf32> to vector<6x256xf32>
    %263 = arith.mulf %260, %262 : vector<6x256xf32>
    %264 = arith.addf %259, %263 : vector<6x256xf32>
    %265 = vector.broadcast %69 : vector<1x256xf32> to vector<6x256xf32>
    %266 = arith.mulf %264, %265 : vector<6x256xf32>
    %267 = arith.addf %248, %266 : vector<6x256xf32>
    %c0_61 = arith.constant 0 : index
    %c0_62 = arith.constant 0 : index
    %268 = vector.load %arg14[%c0_61, %c0_62] : memref<6x1xf32, #tpu.memory_space<vmem>>, vector<6x1xf32>
    %269 = vector.broadcast %268 : vector<6x1xf32> to vector<6x256xf32>
    %270 = arith.addf %267, %269 : vector<6x256xf32>
    %271 = arith.mulf %203, %270 : vector<6x256xf32>
    %c0_63 = arith.constant 0 : index
    %c0_64 = arith.constant 0 : index
    %272 = vector.load %arg15[%c0_63, %c0_64] : memref<12x6xf32, #tpu.memory_space<vmem>>, vector<12x6xf32>
    %cst_65 = arith.constant dense<0.000000e+00> : vector<12x256xf32>
    %273 = tpu.matmul %272, %271, %cst_65 {dimension_numbers = #tpu.dot_dimension_numbers<[1], [0], [0], [1], [0, 0, 1, 1], [], []>} : vector<12x6xf32>, vector<6x256xf32>, vector<12x256xf32> -> vector<12x256xf32>
    %c0_66 = arith.constant 0 : index
    %c0_67 = arith.constant 0 : index
    %274 = vector.load %arg16[%c0_66, %c0_67] : memref<12x1xf32, #tpu.memory_space<vmem>>, vector<12x1xf32>
    %275 = vector.broadcast %274 : vector<12x1xf32> to vector<12x256xf32>
    %276 = arith.addf %273, %275 : vector<12x256xf32>
    %c0_68 = arith.constant 0 : index
    %c0_69 = arith.constant 0 : index
    %277 = vector.load %arg17[%c0_68, %c0_69] : memref<6x12xf32, #tpu.memory_space<vmem>>, vector<6x12xf32>
    %278 = arith.mulf %136, %276 : vector<12x256xf32>
    %cst_70 = arith.constant dense<0.000000e+00> : vector<6x256xf32>
    %279 = tpu.matmul %277, %278, %cst_70 {dimension_numbers = #tpu.dot_dimension_numbers<[1], [0], [0], [1], [0, 0, 1, 1], [], []>} : vector<6x12xf32>, vector<12x256xf32>, vector<6x256xf32> -> vector<6x256xf32>
    %c0_71 = arith.constant 0 : index
    %c0_72 = arith.constant 0 : index
    %280 = vector.load %arg18[%c0_71, %c0_72] : memref<6x1xf32, #tpu.memory_space<vmem>>, vector<6x1xf32>
    %281 = vector.broadcast %280 : vector<6x1xf32> to vector<6x256xf32>
    %282 = arith.addf %279, %281 : vector<6x256xf32>
    %283 = arith.addf %282, %1 : vector<6x256xf32>
    %c0_73 = arith.constant 0 : index
    %c0_74 = arith.constant 0 : index
    %c0_75 = arith.constant 0 : index
    %284 = vector.load %arg19[%c0_73, %c0_74, %c0_75] : memref<1x6x256xf32, #tpu.memory_space<vmem>>, vector<1x6x256xf32>
    %285 = vector.shape_cast %284 : vector<1x6x256xf32> to vector<6x256xf32>
    %286 = vector.shape_cast %283 : vector<6x256xf32> to vector<1x6x256xf32>
    tpu.vector_store %arg19[%c0_73, %c0_74, %c0_75], %286 {strides = array<i32>} : memref<1x6x256xf32, #tpu.memory_space<vmem>>, vector<1x6x256xf32>,
    return
  }
  func.func @transform_0(%arg0: i32, %arg1: i32) -> (i32, i32, i32) {
    %c0_i32 = arith.constant 0 : i32
    %c0_i32_0 = arith.constant 0 : i32
    return %arg0, %c0_i32, %arg1 : i32, i32, i32
  }
  func.func @transform_1(%arg0: i32, %arg1: i32) -> (i32, i32) {
    %c0_i32 = arith.constant 0 : i32
    %c0_i32_0 = arith.constant 0 : i32
    %c0_i32_1 = arith.constant 0 : i32
    return %c0_i32, %c0_i32_0 : i32, i32
  }
  func.func @transform_2(%arg0: i32, %arg1: i32) -> (i32, i32) {
    %c0_i32 = arith.constant 0 : i32
    %c0_i32_0 = arith.constant 0 : i32
    %c0_i32_1 = arith.constant 0 : i32
    return %c0_i32, %c0_i32_0 : i32, i32
  }
  func.func @transform_3(%arg0: i32, %arg1: i32) -> (i32, i32) {
    %c0_i32 = arith.constant 0 : i32
    %c0_i32_0 = arith.constant 0 : i32
    %c0_i32_1 = arith.constant 0 : i32
    return %c0_i32, %c0_i32_0 : i32, i32
  }
  func.func @transform_4(%arg0: i32, %arg1: i32) -> (i32, i32) {
    %c0_i32 = arith.constant 0 : i32
    %c0_i32_0 = arith.constant 0 : i32
    %c0_i32_1 = arith.constant 0 : i32
    return %c0_i32, %c0_i32_0 : i32, i32
  }
  func.func @transform_5(%arg0: i32, %arg1: i32) -> (i32, i32) {
    %c0_i32 = arith.constant 0 : i32
    %c0_i32_0 = arith.constant 0 : i32
    %c0_i32_1 = arith.constant 0 : i32
    return %c0_i32, %c0_i32_0 : i32, i32
  }
  func.func @transform_6(%arg0: i32, %arg1: i32) -> (i32, i32) {
    %c0_i32 = arith.constant 0 : i32
    %c0_i32_0 = arith.constant 0 : i32
    %c0_i32_1 = arith.constant 0 : i32
    return %c0_i32, %c0_i32_0 : i32, i32
  }
  func.func @transform_7(%arg0: i32, %arg1: i32) -> (i32, i32) {
    %c0_i32 = arith.constant 0 : i32
    %c0_i32_0 = arith.constant 0 : i32
    %c0_i32_1 = arith.constant 0 : i32
    return %c0_i32, %c0_i32_0 : i32, i32
  }
  func.func @transform_8(%arg0: i32, %arg1: i32) -> (i32, i32) {
    %c0_i32 = arith.constant 0 : i32
    %c0_i32_0 = arith.constant 0 : i32
    %c0_i32_1 = arith.constant 0 : i32
    return %c0_i32, %c0_i32_0 : i32, i32
  }
  func.func @transform_9(%arg0: i32, %arg1: i32) -> (i32, i32) {
    %c0_i32 = arith.constant 0 : i32
    %c0_i32_0 = arith.constant 0 : i32
    %c0_i32_1 = arith.constant 0 : i32
    return %c0_i32, %c0_i32_0 : i32, i32
  }
  func.func @transform_10(%arg0: i32, %arg1: i32) -> (i32, i32) {
    %c0_i32 = arith.constant 0 : i32
    %c0_i32_0 = arith.constant 0 : i32
    %c0_i32_1 = arith.constant 0 : i32
    return %c0_i32, %c0_i32_0 : i32, i32
  }
  func.func @transform_11(%arg0: i32, %arg1: i32) -> (i32, i32) {
    %c0_i32 = arith.constant 0 : i32
    %c0_i32_0 = arith.constant 0 : i32
    %c0_i32_1 = arith.constant 0 : i32
    return %c0_i32, %c0_i32_0 : i32, i32
  }
  func.func @transform_12(%arg0: i32, %arg1: i32) -> (i32, i32) {
    %c0_i32 = arith.constant 0 : i32
    %c0_i32_0 = arith.constant 0 : i32
    %c0_i32_1 = arith.constant 0 : i32
    return %c0_i32, %c0_i32_0 : i32, i32
  }
  func.func @transform_13(%arg0: i32, %arg1: i32) -> (i32, i32) {
    %c0_i32 = arith.constant 0 : i32
    %c0_i32_0 = arith.constant 0 : i32
    %c0_i32_1 = arith.constant 0 : i32
    return %c0_i32, %c0_i32_0 : i32, i32
  }
  func.func @transform_14(%arg0: i32, %arg1: i32) -> (i32, i32) {
    %c0_i32 = arith.constant 0 : i32
    %c0_i32_0 = arith.constant 0 : i32
    %c0_i32_1 = arith.constant 0 : i32
    return %c0_i32, %c0_i32_0 : i32, i32
  }
  func.func @transform_15(%arg0: i32, %arg1: i32) -> (i32, i32) {
    %c0_i32 = arith.constant 0 : i32
    %c0_i32_0 = arith.constant 0 : i32
    %c0_i32_1 = arith.constant 0 : i32
    return %c0_i32, %c0_i32_0 : i32, i32
  }
  func.func @transform_16(%arg0: i32, %arg1: i32) -> (i32, i32) {
    %c0_i32 = arith.constant 0 : i32
    %c0_i32_0 = arith.constant 0 : i32
    %c0_i32_1 = arith.constant 0 : i32
    return %c0_i32, %c0_i32_0 : i32, i32
  }
  func.func @transform_17(%arg0: i32, %arg1: i32) -> (i32, i32, i32) {
    %c0_i32 = arith.constant 0 : i32
    %c0_i32_0 = arith.constant 0 : i32
    return %arg0, %c0_i32, %arg1 : i32, i32, i32
  }
}

</mosaic_0001>

<bundles_post_ra>
// kernel: gdfn_pallas.1
= control target key start
LH: loop header
LB: loop body
LE: loop exit
PB: predicated region body
PF: predicated region fallthrough
CT: control target
= control target key end

     0   :  { %s2697_s24 = smov 0   ;;  %s2699_s25 = smov 0   ;;  %s3392_s0 = inlined_call_operand.vmem [shape: f32[2,6,256], index: 0, kind: input, shape index: {}]   ;;  %s3393_s1 = inlined_call_operand.vmem [shape: f32[12,6], index: 1, kind: input, shape index: {}]   ;;  %s3394_s2 = inlined_call_operand.vmem [shape: f32[12,1], index: 2, kind: input, shape index: {}]   ;;  %s3395_s3 = inlined_call_operand.vmem [shape: f32[6,6], index: 3, kind: input, shape index: {}]   ;;  %s3396_s4 = inlined_call_operand.vmem [shape: f32[6,1], index: 4, kind: input, shape index: {}]   ;;  %s3397_s5 = inlined_call_operand.vmem [shape: f32[6,6], index: 5, kind: input, shape index: {}]   ;;  %s3398_s6 = inlined_call_operand.vmem [shape: f32[6,1], index: 6, kind: input, shape index: {}]   ;;  %s3399_s7 = inlined_call_operand.vmem [shape: f32[12,9], index: 7, kind: input, shape index: {}]   ;;  %s3400_s8 = inlined_call_operand.vmem [shape: f32[12,1], index: 8, kind: input, shape index: {}]   ;;  %s3401_s9 = inlined_call_operand.vmem [shape: f32[6,9], index: 9, kind: input, shape index: {}]   ;;  %s3402_s10 = inlined_call_operand.vmem [shape: f32[6,1], index: 10, kind: input, shape index: {}]   ;;  %s3403_s11 = inlined_call_operand.vmem [shape: f32[6,9], index: 11, kind: input, shape index: {}]   ;;  %s3404_s12 = inlined_call_operand.vmem [shape: f32[6,1], index: 12, kind: input, shape index: {}]   ;;  %s3405_s13 = inlined_call_operand.vmem [shape: f32[12,6], index: 13, kind: input, shape index: {}]   ;;  %s3406_s14 = inlined_call_operand.vmem [shape: f32[12,1], index: 14, kind: input, shape index: {}]   ;;  %s3407_s15 = inlined_call_operand.vmem [shape: f32[6,12], index: 15, kind: input, shape index: {}]   ;;  %s3408_s16 = inlined_call_operand.vmem [shape: f32[6,1], index: 16, kind: input, shape index: {}]   ;;  %s3409_s17 = inlined_call_operand.vmem [shape: f32[2,6,256], index: 17, kind: output, shape index: {}]  }
   0x1   :  { %3420 = sst [smem:[#allocation3_spill]] %s3392_s0  ;;  %s2701_s26 = smov 0  }
   0x2   :  { %3421 = sst [smem:[#allocation4_spill]] %s3393_s1 }
   0x3 LB: > { %s39_s27 = sadd.s32 1, %s2583_s25  ;;  %p2411_p0 = scmp.ge.s32.totalorder %s2587_s26, 1  ;;  %s2587_s26 = sphi %s2701_s26, %s27_s26   ;;  %s2583_s25 = sphi %s2699_s25, %s3430_s25   ;;  %s2579_s24 = sphi %s2697_s24, %s3429_s24  }
   0x4   : > { %p41_p1 = scmp.ge.s32.totalorder %s39_s27, 2  ;;  %p508_p2 = scmp.lt.s32.totalorder %s2587_s26, 3 }
   0x6   : > { %s3432_s27 = smov (%p41_p1, %s39_s27), 0  ;;  %p509_p3 = pnand %p2411_p0, %p508_p2 }
   0x7   : > { %p569_p4 = scmp.lt.s32.totalorder (!%p509_p3), %s2579_s24, 1  ;;  %vm590_vm0 = vcmask (!%p509_p3), 5120   ;;  %vm592_vm1 = vcmask (!%p509_p3), 275720   ;;  %v2589_v0 = vmov (!%p509_p3), 0.0   ;;  %s3422_s30 = sld [smem:[#allocation3_spill]] (!%p509_p3)  ;;  %vm763_vm2 = vcmask (!%p509_p3), 48128  }
   0x8   : > { %512 = sbr.rel (%p509_p3) target bundleno = 1254 (0x4e6), region = 88  ;;  %591 = vst.msk [vmem:[#allocation2] sm:$0x3f] (!%p509_p3), %vm590_vm0, %v2589_v0  ;;  %843 = vmatprep.mubr.f32.mxu0 (!%p509_p3), %v2589_v0  ;;  %s2590_s19 = smov (!%p509_p3), 17   ;;  %v1382_v4 = vld [vmem:[%s3396_s4] sm:$0x3f] (!%p509_p3) }
   0x9   : > { %593 = vst.msk [vmem:[#allocation2 + $0x10] sm:$0x3f] (!%p509_p3), %vm592_vm1, %v2589_v0  ;;  %s3423_s21 = sld [smem:[#allocation4_spill]] (!%p509_p3)  ;;  %v2591_v5 = vmov (!%p509_p3), 0   ;;  %v2744_v6 = vld [vmem:[%s3401_s9] sm:$0x3f] (!%p509_p3) }
   0xa   : > { %2520 = vset.pattern.permute.xlu1 (!%p509_p3), %v2591_v5  ;;  %v2592_v7 = vmov (!%p509_p3), 4   ;;  %v1751_v8 = vld [vmem:[%s3398_s6] sm:$0x3f] (!%p509_p3)  ;;  %v2593_v10 = vmov (!%p509_p3), 5   ;;  %v2594_v11 = vmov (!%p509_p3), 7   ;;  %v2595_v12 = vmov (!%p509_p3), 3  }
   0xb   : > { %1385 = vperm.xlu1 (!%p509_p3), %2520, %v1382_v4   ;;  %2521 = vset.pattern.permute.xlu0 (!%p509_p3), %v2592_v7  ;;  %v2754_v9 = vld [vmem:[%s3403_s11] sm:$0x3f] (!%p509_p3)  ;;  %v2596_v13 = vmov (!%p509_p3), 2   ;;  %v2597_v14 = vmov (!%p509_p3), 8   ;;  %v2598_v15 = vmov (!%p509_p3), 6   ;;  %v2599_v16 = vmov (!%p509_p3), 1  }
   0xc   : > { %vm598_vm3 = vcmask (!%p509_p3), 136200   ;;  %vm610_vm4 = vcmask (!%p509_p3), 136192   ;;  %vm603_vm5 = vcmask (!%p509_p3), 138240   ;;  %vm607_vm6 = vcmask (!%p509_p3), 1045640   ;;  %s3416_s1 = smov (!%p509_p3), 112   ;;  %s3414_s20 = smov (!%p509_p3), 96  }
   0xd   : > { %vm612_vm7 = vcmask (!%p509_p3), 267400   ;;  %vm617_vm8 = vcmask (!%p509_p3), 1045504   ;;  %vm632_vm9 = vcmask (!%p509_p3), 275456   ;;  %vm2600_vm10 = vmmov (!%p509_p3), 0   ;;  %s2603_s22 = smov (!%p509_p3), 2   ;;  %s3424_s23 = smov (!%p509_p3), 112  }
   0xe   : > { %s3425_s29 = smov (!%p509_p3), 96  }
   0xf   : > { %s3434_s24 = smov (!%p569_p4, %s2579_s24), 1  ;;  %v2733_v3 = vld [vmem:[%s3423_s21] sm:$0xff]  ;;  %1754 = vperm.xlu1 %2520, %v1751_v8  }
  0x10   : > { %s3411_s28 = sshll.u32 %s3434_s24, 4  ;;  %2459 = vmatprep.mubr.msk.f32.mxu1 %vm763_vm2, %v2733_v3 }
  0x11   : > { %s2726_s18 = scalar_lea.vmem %s3422_s30, %s3411_s28 }
  0x12   : > { %v589_v1 = vld [vmem:[%s2726_s18 + $0x8] sm:$0x3f]  ;;  %v588_v2 = vld [vmem:[%s2726_s18] sm:$0x3f] }
  0x13   : > { %595 = vrot.lane.b32.xlu0 %v589_v1, %s2590_s19  ;;  %2522 = vset.pattern.permute.xlu1 %v2593_v10 }
  0x14   : > { %1676 = vperm.xlu1 %2522, %v2744_v6  }
  0x17   : > { %601 = vrot.lane.b32.xlu0 %v588_v2, %s2590_s19  ;;  %s3412_s19 = smov 127  }
  0x18   : > { %2523 = vset.pattern.permute.xlu1 %v2592_v7 }
  0x19   : > { %1972 = vperm.xlu1 %2523, %v2754_v9  }
  0x1b   : > { %1603 = vperm.xlu0 %2521, %v2744_v6  }
  0x1d   : > { %2525 = vset.pattern.permute.xlu1 %v2594_v11 }
  0x1e   : > { %1627 = vperm.xlu1 %2525, %v2744_v6  }
  0x1f   : > { %2524 = vset.pattern.permute.xlu0 %v2593_v10 }
  0x20   : > { %2045 = vperm.xlu0 %2524, %v2754_v9  }
  0x22   : > { %2526 = vset.pattern.permute.xlu1 %v2597_v14 }
  0x23   : > { %1700 = vperm.xlu1 %2526, %v2744_v6  }
  0x24   : > { %2527 = vset.pattern.permute.xlu0 %v2594_v11 }
  0x25   : > { %1996 = vperm.xlu0 %2527, %v2754_v9  }
  0x27   : > { %2069 = vperm.xlu1 %2526, %v2754_v9  }
  0x29   : > { %2529 = vset.pattern.permute.xlu0 %v2595_v12 }
  0x2a   : > { %1914 = vperm.xlu0 %2529, %v2754_v9  }
  0x2b   : > { %2528 = vset.pattern.permute.xlu1 %v2595_v12 }
  0x2c   : > { %1545 = vperm.xlu1 %2528, %v2744_v6  }
  0x2e   : > { %2532 = vset.pattern.permute.xlu0 %v2596_v13 }
  0x2f   : > { %1666 = vperm.xlu0 %2532, %v2744_v6  }
  0x30   : > { %2530 = vset.pattern.permute.xlu1 %v2598_v15 }
  0x31   : > { %1567 = vperm.xlu1 %2530, %v2744_v6  }
  0x33   : > { %2035 = vperm.xlu0 %2532, %v2754_v9  }
  0x35   : > { %2531 = vset.pattern.permute.xlu1 %v2599_v16 }
  0x36   : > { %1593 = vperm.xlu1 %2531, %v2744_v6  }
  0x37   : > { %2540 = vset.pattern.permute.xlu0 %v2591_v5 }
  0x3a   : > { %2533 = vset.pattern.permute.xlu1 %v2598_v15 }
  0x3b   : > { %1936 = vperm.xlu1 %2533, %v2754_v9  }
  0x3f   : > { %2534 = vset.pattern.permute.xlu1 %v2599_v16 }
  0x40   : > { %1962 = vperm.xlu1 %2534, %v2754_v9  }
  0x44   : > { %2541 = vset.pattern.permute.xlu1 %v2591_v5 }
  0x85   : > { %v596_v17 = vpop.permute.xlu0 %595 }
  0x86   : > { %599 = vst.msk [vmem:[#allocation2] sm:$0x3f] %vm598_vm3, %v596_v17 }
  0x87   : > { %611 = vst.msk [vmem:[#allocation2 + $0x10] sm:$0x3f] %vm610_vm4, %v596_v17  ;;  %vm987_vm4 = vcmask 916480  }
  0x89   : > { %v602_v18 = vpop.permute.xlu0 %601 }
  0x8a   : > { %v604_v19 = vsel %vm603_vm5, %v602_v18, %v596_v17  ;;  %608 = vst.msk [vmem:[#allocation2] sm:$0x3f] %vm607_vm6, %v602_v18  ;;  %vm1032_vm5 = vcmask 785408   ;;  %vm1322_vm6 = vcmask 15360  }
  0x8b   : > { %613 = vst.msk [vmem:[#allocation2 + $0x10] sm:$0x3f] %vm612_vm7, %v602_v18  ;;  %609 = vst [vmem:[#allocation2 + $0x8] sm:$0x3f] %v604_v19 }
  0x91   : > { %v614_v21 = vld [vmem:[#allocation2] sm:$0x3f] }
  0x92   : > { %v616_v20 = vld [vmem:[#allocation2 + $0x10] sm:$0x3f]  ;;  %v615_v23 = vld [vmem:[#allocation2 + $0x8] sm:$0x3f]  ;;  %v618_v24 = vsel %vm617_vm8, %v614_v21, 0.0 }
  0x93   : > { %v633_v22 = vsel %vm632_vm9, %v616_v20, 0.0  ;;  %v625_v26 = vsel %vm617_vm8, %v615_v23, 0.0  ;;  %v619_v27 = vrot.slane %v618_v24, 4 }
  0x94   : > { %v634_v25 = vrot.slane %v633_v22, 4  ;;  %v626_v28 = vrot.slane %v625_v26, 4 }
  0x95   : > { %v620_v30 = vadd.f32 %v619_v27, %v618_v24 }
  0x96   : > { %v635_v29 = vadd.f32 %v634_v25, %v633_v22  ;;  %v627_v31 = vadd.f32 %v626_v28, %v625_v26 }
  0x97   : > { %v621_v33 = vrot.slane %v620_v30, 2 }
  0x98   : > { %v636_v32 = vrot.slane %v635_v29, 2  ;;  %v628_v34 = vrot.slane %v627_v31, 2 }
  0x99   : > { %v622_v36 = vadd.f32 %v621_v33, %v620_v30 }
  0x9a   : > { %v637_v35 = vadd.f32 %v636_v32, %v635_v29  ;;  %v629_v37 = vadd.f32 %v628_v34, %v627_v31  ;;  %v748_v34 = vld [vmem:[%s3423_s21 + $0x8] sm:$0xf] }
  0x9b   : > { %v623_v39 = vrot.slane %v622_v36, 1 }
  0x9c   : > { %v638_v38 = vrot.slane %v637_v35, 1  ;;  %v630_v40 = vrot.slane %v629_v37, 1 }
  0x9d   : > { %v624_v42 = vadd.f32 %v623_v39, %v622_v36  ;;  %v1380_v36 = vld [vmem:[%s3395_s3] sm:$0x3f] }
  0x9e   : > { %v639_v41 = vadd.f32 %v638_v38, %v637_v35  ;;  %v631_v43 = vadd.f32 %v630_v40, %v629_v37  ;;  %v1386_v37 = vpop.permute.xlu1 %1385  ;;  %v683_v38 = vlaneseq }
  0x9f   : > { %v641_v45 = vmul.f32 0.16666667, %v624_v42 }
  0xa0   : > { %v643_v44 = vmul.f32 0.16666667, %v639_v41  ;;  %v642_v46 = vmul.f32 0.16666667, %v631_v43  ;;  %v2830_v40 = vand.u32 127, %v683_v38 }
  0xa1   : > { %v644_v48 = vsub.f32 %v614_v21, %v641_v45 }
  0xa2   : > { %v646_v47 = vsub.f32 %v616_v20, %v643_v44  ;;  %v645_v49 = vsub.f32 %v615_v23, %v642_v46  ;;  %v2828_v39 = vpop.permute.xlu1 %1754  ;;  %vm687_vm11 = vcmp.ge.s32.totalorder %v2830_v40, 1  ;;  %vm690_vm12 = vcmp.lt.s32.totalorder %v2830_v40, 17 }
  0xa3   : > { %v647_v51 = vmul.f32 %v644_v48, %v644_v48  ;;  %v686_v42 = vadd.s32 256, %v2830_v40  ;;  %vm693_vm13 = vmand %vm687_vm11, %vm690_vm12 }
  0xa4   : > { %v649_v50 = vmul.f32 %v646_v47, %v646_v47  ;;  %v648_v52 = vmul.f32 %v645_v49, %v645_v49  ;;  %v2416_v46 = vsel %vm693_vm13, 1.0, %v2589_v0  ;;  %vm2234_vm13 = vcmask 97280  }
  0xa5   : > { %v650_v54 = vsel %vm617_vm8, %v647_v51, 0.0  ;;  %vm704_vm14 = vcmp.ge.s32.totalorder %v686_v42, 273  ;;  %vm707_vm15 = vcmp.lt.s32.totalorder %v686_v42, 289 }
  0xa6   : > { %v664_v53 = vsel %vm632_vm9, %v649_v50, 0.0  ;;  %v657_v56 = vsel %vm617_vm8, %v648_v52, 0.0  ;;  %v651_v57 = vrot.slane %v650_v54, 4  ;;  %v1677_v41 = vpop.permute.xlu1 %1676  ;;  %vm710_vm0 = vmand %vm704_vm14, %vm707_vm15  ;;  %vm1187_vm9 = vcmask 1039360  }
  0xa7   : > { %v665_v55 = vrot.slane %v664_v53, 4  ;;  %v658_v58 = vrot.slane %v657_v56, 4 }
  0xa8   : > { %v652_v60 = vadd.f32 %v651_v57, %v650_v54  ;;  %v2417_v57 = vsel %vm710_vm0, 1.0, %v2589_v0 }
  0xa9   : > { %v666_v59 = vadd.f32 %v665_v55, %v664_v53  ;;  %v659_v61 = vadd.f32 %v658_v58, %v657_v56  ;;  %v1604_v58 = vpop.permute.xlu0 %1603 }
  0xaa   : > { %v653_v63 = vrot.slane %v652_v60, 2  ;;  %v2835_v43 = vpop.permute.xlu1 %1972 }
  0xab   : > { %v667_v62 = vrot.slane %v666_v59, 2  ;;  %v660_v1 = vrot.slane %v659_v61, 2 }
  0xac   : > { %v654_v4 = vadd.f32 %v653_v63, %v652_v60  ;;  %v2859_v63 = vsub.f32 1.0, %v2417_v57 }
  0xad   : > { %v668_v2 = vadd.f32 %v667_v62, %v666_v59  ;;  %v661_v8 = vadd.f32 %v660_v1, %v659_v61 }
  0xae   : > { %v655_v18 = vrot.slane %v654_v4, 1  ;;  %v1628_v55 = vpop.permute.xlu1 %1627 }
  0xaf   : > { %v669_v17 = vrot.slane %v668_v2, 1  ;;  %v662_v19 = vrot.slane %v661_v8, 1 }
  0xb0   : > { %v656_v21 = vadd.f32 %v655_v18, %v654_v4 }
  0xb1   : > { %v670_v20 = vadd.f32 %v669_v17, %v668_v2  ;;  %v663_v22 = vadd.f32 %v662_v19, %v661_v8 }
  0xb2   : > { %v671_v24 = vmul.f32 0.16666667, %v656_v21  ;;  %v1701_v17 = vpop.permute.xlu1 %1700 }
  0xb3   : > { %v673_v23 = vmul.f32 0.16666667, %v670_v20  ;;  %v672_v25 = vmul.f32 0.16666667, %v663_v22 }
  0xb4   : > { %v674_v27 = vadd.f32 1e-06, %v671_v24 }
  0xb5   : > { %v676_v26 = vadd.f32 1e-06, %v673_v23  ;;  %v675_v28 = vadd.f32 1e-06, %v672_v25 }
  0xb7   : > { %2557 = vrsqrt.f32 %v676_v26 }
  0xb8   : > { %2559 = vrsqrt.f32 %v675_v28 }
  0xb9   : > { %2561 = vrsqrt.f32 %v674_v27 }
  0xc1   : > { %v2558_v29 = vpop.eup %2557 }
  0xc2   : > { %v2560_v30 = vpop.eup %2559  ;;  %v682_v31 = vmul.f32 %v2558_v29, %v646_v47  ;;  %v2046_v29 = vpop.permute.xlu0 %2045 }
  0xc3   : > { %v2562_v32 = vpop.eup %2561  ;;  %v681_v33 = vmul.f32 %v2560_v30, %v645_v49  ;;  %v2846_v49 = vsub.f32 1.0, %v2416_v46  ;;  %v2910_v46 = vadd.s32 128, %v2830_v40 }
  0xc4   : > { %2457 = vmatprep.subr.msk.mxu1 %vm617_vm8, %v682_v31  ;;  %v680_v35 = vmul.f32 %v2562_v32, %v644_v48 }
  0xc5   : > { %2422 = vmatprep.subr.msk.mxu0 %vm617_vm8, %v681_v33  ;;  %2458 = vmatpush3.msk.msra.mxu1 %vm617_vm8, %v682_v31  ;;  %v734_v57 = vand.u32 15, %v2910_v46 }
  0xc6   : > { %2423 = vmatpush1.msk.msra.mxu0 %vm617_vm8, %v680_v35  ;;  %2460 = vmatmul.mubr.msk.f32.vlgmr.msra.gmra.mrb[0].mxu1 %vm763_vm2, %v748_v34 }
  0xc7   : > { %2429 = vmatprep.subr.msk.mxu1 %vm617_vm8, %v681_v33  ;;  %2424 = vmatmul.mubr.msk.f32.vlgmr.msra.gmra.mrb[0].mxu0 %vm763_vm2, %v2733_v3  ;;  %v1749_v3 = vld [vmem:[%s3397_s5] sm:$0x3f]  ;;  %vm742_vm3 = vcmp.ne.s32.totalorder %v734_v57, 15  ;;  %vm736_vm7 = vcmp.ne.s32.totalorder %v734_v57, 0 }
  0xc8   : > { %2430 = vmatpush1.msk.msra.mxu1 %vm617_vm8, %v680_v35  ;;  %2462 = vmatprep.subr.mxu0 %v2589_v0 }
  0xc9   : > { %2463 = vmatpush3.msk.msra.mxu0 %vm617_vm8, %v682_v31  ;;  %2434 = vmatprep.subr.msk.mxu1 %vm617_vm8, %v681_v33 }
  0xca   : > { %1455 = vmatprep.mubr.f32.mxu1 %v2589_v0  ;;  %849 = vmatprep.mubr.f32.mxu0 %v2589_v0 }
  0xcb   : > { %2431 = vmatmul.mubr.msk.f32.vlgmr.msra.gmra.mrb[2].mxu1 %vm763_vm2, %v1380_v36  ;;  %2425 = vmatmul.mubr.msk.f32.gmra.mrb[2].mxu0 %vm763_vm2, %v748_v34 }
  0xcc   : > { %2435 = vmatpush1.msk.msra.mxu1 %vm617_vm8, %v680_v35  ;;  %1824 = vmatprep.mubr.f32.mxu1 %v2589_v0 }
  0xcd   : > { %2464 = vmatprep.mubr.msk.f32.mxu0 %vm2600_vm10, %v2589_v0  ;;  %2467 = vmatprep.subr.mxu0 %v2589_v0 }
  0xcf   : > { %2436 = vmatmul.mubr.msk.f32.vlgmr.msra.gmra.mrb[4].mxu1 %vm763_vm2, %v1749_v3  ;;  %2465 = vmatmul.mubr.msk.f32.vlgmr.msra.gmra.mrb[4].mxu0 %vm763_vm2, %v1380_v36 }
  0xd0   : > { %2468 = vmatpush3.msk.msra.mxu0 %vm617_vm8, %v682_v31  ;;  %2469 = vmatprep.mubr.msk.f32.mxu0 %vm2600_vm10, %v2589_v0  ;;  %vm1351_vm10 = vcmask 1031168  }
  0xd1   : > { %2210 = vmatprep.mubr.f32.mxu1 %v2589_v0 }
  0xd3   : > { %2470 = vmatmul.mubr.msk.f32.vlgmr.msra.gmra.mrb[6].mxu0 %vm763_vm2, %v1749_v3 }
  0xd4   : > { %2309 = vmatprep.mubr.f32.mxu0 %v2589_v0 }
 0x199   : > { %v2837_v44 = vpop.f32.mrb[0].mxu1 }
 0x19a   : > { %v2839_v45 = vpop.f32.mrb[1].mxu1  ;;  %v2842_v47 = vpop.f32.mrb[0].mxu0 }
 0x19b   : > { %v2844_v48 = vpop.f32.mrb[1].mxu0 }
 0x19e   : > { %v1457_v50 = vpop.f32.mrb[2].mxu1  ;;  %v2848_v51 = vpop.f32.mrb[2].mxu0 }
 0x19f   : > { %v1458_v52 = vadd.f32 %v1457_v50, %v1386_v37  ;;  %v1459_v53 = vpop.f32.mrb[3].mxu1  ;;  %v2850_v54 = vpop.f32.mrb[3].mxu0 }
 0x1a0   : > { %v2852_v56 = vadd.f32 %v1459_v53, %v1386_v37 }
 0x1a1   : > { %v2856_v59 = vmul.f32 %v1458_v52, %v2846_v49  ;;  %v2070_v52 = vpop.permute.xlu1 %2069 }
 0x1a2   : > { %v1826_v60 = vpop.f32.mrb[4].mxu1  ;;  %v1528_v61 = vpop.f32.mrb[4].mxu0  ;;  %v1607_v62 = vmul.f32 %v1604_v58, %v2852_v56  ;;  %v1680_v19 = vmul.f32 %v1677_v41, %v2852_v56  ;;  %v1631_v23 = vmul.f32 %v1628_v55, %v2852_v56  ;;  %v1704_v26 = vmul.f32 %v1701_v17, %v2852_v56 }
 0x1a3   : > { %v1529_v1 = vadd.f32 %v1528_v61, %v1386_v37  ;;  %v1828_v2 = vpop.f32.mrb[5].mxu1  ;;  %v1679_v4 = vmul.f32 %v1677_v41, %v2856_v59  ;;  %v2466_v8 = vpop.f32.mrb[5].mxu0  ;;  %v1703_v21 = vmul.f32 %v1701_v17, %v2856_v59  ;;  %v1827_v24 = vadd.f32 %v1826_v60, %v2828_v39 }
 0x1a4   : > { %1614 = vrot.lane.b32.xlu1 %v1607_v62, %s3416_s1  ;;  %v1606_v30 = vmul.f32 %v1604_v58, %v2856_v59  ;;  %v2888_v32 = vadd.f32 %v1828_v2, %v2828_v39  ;;  %v1630_v33 = vmul.f32 %v1628_v55, %v2856_v59 }
 0x1a5   : > { %1685 = vrot.lane.b32.xlu0 %v1679_v4, %s3416_s1  ;;  %v2866_v20 = vmul.f32 %v1529_v1, %v2859_v63  ;;  %v2878_v27 = vmul.f32 %v1827_v24, %v2846_v49  ;;  %v2421_v1 = vsel %vm742_vm3, 1.0, %v2589_v0  ;;  %v1546_v4 = vpop.permute.xlu1 %1545 }
 0x1a6   : > { %v1897_v18 = vpop.f32.mrb[6].mxu0  ;;  %v1976_v36 = vmul.f32 %v2835_v43, %v2888_v32  ;;  %v2049_v38 = vmul.f32 %v2046_v29, %v2888_v32  ;;  %v2073_v53 = vmul.f32 %v2070_v52, %v2888_v32 }
 0x1a7   : > { %v2471_v22 = vpop.f32.mrb[7].mxu0  ;;  %v1608_v25 = vmul.f32 %v1604_v58, %v2866_v20  ;;  %v1681_v28 = vmul.f32 %v1677_v41, %v2866_v20  ;;  %v2048_v31 = vmul.f32 %v2046_v29, %v2878_v27  ;;  %v1898_v34 = vadd.f32 %v1897_v18, %v2828_v39  ;;  %v1997_v41 = vpop.permute.xlu0 %1996 }
 0x1a8   : > { %1687 = vrot.lane.b32.xlu1 %v1680_v19, %s3416_s1  ;;  %v1632_v35 = vmul.f32 %v1628_v55, %v2866_v20  ;;  %v1705_v37 = vmul.f32 %v1701_v17, %v2866_v20  ;;  %v2000_v42 = vmul.f32 %v1997_v41, %v2888_v32  ;;  %v733_v55 = vand.u32 15, %v2830_v40 }
 0x1a9   : > { %1709 = vrot.lane.b32.xlu0 %v1703_v21, %s3414_s20  ;;  %v2898_v3 = vmul.f32 %v1898_v34, %v2859_v63  ;;  %v1975_v60 = vmul.f32 %v2835_v43, %v2878_v27  ;;  %v1999_v2 = vmul.f32 %v1997_v41, %v2878_v27  ;;  %v1568_v17 = vpop.permute.xlu1 %1567  ;;  %v1550_v18 = vmul.f32 %v1546_v4, %v2866_v20 }
 0x1aa   : > { %vm741_vm1 = vcmp.ne.s32.totalorder %v733_v55, 15  ;;  %v1549_v21 = vmul.f32 %v1546_v4, %v2852_v56  ;;  %vm735_vm11 = vcmp.ne.s32.totalorder %v733_v55, 0 }
 0x1ab   : > { %v1977_v39 = vmul.f32 %v2835_v43, %v2898_v3  ;;  %v2050_v50 = vmul.f32 %v2046_v29, %v2898_v3  ;;  %v2001_v58 = vmul.f32 %v1997_v41, %v2898_v3  ;;  %v2074_v61 = vmul.f32 %v2070_v52, %v2898_v3  ;;  %v1915_v19 = vpop.permute.xlu0 %1914  ;;  %v2110_v29 = vld [vmem:[%s3404_s12] sm:$0x3f] }
 0x1ac   : > { %1638 = vrot.lane.b32.xlu1 %v1631_v23, %s3414_s20  ;;  %v2420_v62 = vsel %vm741_vm1, 1.0, %v2589_v0  ;;  %v2072_v43 = vmul.f32 %v2070_v52, %v2878_v27  ;;  %v1917_v22 = vmul.f32 %v1915_v19, %v2878_v27  ;;  %v1918_v24 = vmul.f32 %v1915_v19, %v2888_v32 }
 0x1ad   : > { %1616 = vrot.lane.b32.xlu0 %v1608_v25, %s3416_s1  ;;  %v2535_v8 = vpack.i.bf16 %v2421_v1, %v2420_v62  ;;  %v1594_v23 = vpop.permute.xlu1 %1593  ;;  %v1548_v25 = vmul.f32 %v1546_v4, %v2856_v59 }
 0x1b0   : > { %1711 = vrot.lane.b32.xlu1 %v1704_v26, %s3414_s20 }
 0x1b1   : > { %1689 = vrot.lane.b32.xlu0 %v1681_v28, %s3416_s1  ;;  %v1571_v28 = vmul.f32 %v1568_v17, %v2852_v56 }
 0x1b4   : > { %1612 = vrot.lane.b32.xlu1 %v1606_v30, %s3416_s1 }
 0x1b5   : > { %2054 = vrot.lane.b32.xlu0 %v2048_v31, %s3416_s1  ;;  %v1919_v31 = vmul.f32 %v1915_v19, %v2898_v3 }
 0x1b8   : > { %1636 = vrot.lane.b32.xlu1 %v1630_v33, %s3414_s20  ;;  %v1570_v33 = vmul.f32 %v1568_v17, %v2856_v59 }
 0x1b9   : > { %1640 = vrot.lane.b32.xlu0 %v1632_v35, %s3414_s20  ;;  %v1741_v35 = vld [vmem:[%s3402_s10] sm:$0x3f] }
 0x1bc   : > { %1983 = vrot.lane.b32.xlu1 %v1976_v36, %s3416_s1  ;;  %v2968_v36 = vpop.permute.xlu0 %1666 }
 0x1bd   : > { %1713 = vrot.lane.b32.xlu0 %v1705_v37, %s3414_s20 }
 0x1c0   : > { %2056 = vrot.lane.b32.xlu1 %v2049_v38, %s3416_s1  ;;  %v2972_v38 = vpop.permute.xlu0 %2035 }
 0x1c1   : > { %1985 = vrot.lane.b32.xlu0 %v1977_v39, %s3416_s1 }
 0x1c4   : > { %2007 = vrot.lane.b32.xlu1 %v2000_v42, %s3414_s20 }
 0x1c5   : > { %2058 = vrot.lane.b32.xlu0 %v2050_v50, %s3416_s1 }
 0x1c8   : > { %2080 = vrot.lane.b32.xlu1 %v2073_v53, %s3414_s20 }
 0x1c9   : > { %2009 = vrot.lane.b32.xlu0 %v2001_v58, %s3414_s20 }
 0x1cc   : > { %1981 = vrot.lane.b32.xlu1 %v1975_v60, %s3416_s1 }
 0x1cd   : > { %2082 = vrot.lane.b32.xlu0 %v2074_v61, %s3414_s20 }
 0x1d0   : > { %2005 = vrot.lane.b32.xlu1 %v1999_v2, %s3414_s20  ;;  %v1598_v2 = vmul.f32 %v1594_v23, %v2866_v20 }
 0x1d1   : > { %2078 = vrot.lane.b32.xlu0 %v2072_v43, %s3414_s20  ;;  %v1596_v43 = vmul.f32 %v1594_v23, %v2856_v59 }
 0x1d4   : > { %2536 = vrot.lane.b32.xlu1 %v2535_v8, %s2603_s22  ;;  %s3418_s22 = smov 126  }
 0x1d5   : > { %1537 = vperm.xlu0 %2540, %v2744_v6   ;;  %v1572_v6 = vmul.f32 %v1568_v17, %v2866_v20 }
 0x1d8   : > { %1906 = vperm.xlu1 %2541, %v2754_v9   ;;  %v1937_v9 = vpop.permute.xlu1 %1936 }
 0x1d9   : > { %1558 = vrot.lane.b32.xlu0 %v1550_v18, %s3416_s1  ;;  %v1939_v26 = vmul.f32 %v1937_v9, %v2878_v27  ;;  %v1940_v30 = vmul.f32 %v1937_v9, %v2888_v32  ;;  %v1941_v34 = vmul.f32 %v1937_v9, %v2898_v3 }
 0x1dc   : > { %1556 = vrot.lane.b32.xlu1 %v1549_v21, %s3416_s1  ;;  %v2970_v37 = vpop.permute.xlu1 %1962 }
 0x1dd   : > { %1923 = vrot.lane.b32.xlu0 %v1917_v22, %s3416_s1  ;;  %v1597_v22 = vmul.f32 %v1594_v23, %v2852_v56 }
 0x1e0   : > { %1925 = vrot.lane.b32.xlu1 %v1918_v24, %s3416_s1 }
 0x1e1   : > { %1580 = vrot.lane.b32.xlu0 %v1572_v6, %s3414_s20 }
 0x1e4   : > { %1554 = vrot.lane.b32.xlu1 %v1548_v25, %s3416_s1 }
 0x1e5   : > { %1945 = vrot.lane.b32.xlu0 %v1939_v26, %s3414_s20 }
 0x1e8   : > { %1578 = vrot.lane.b32.xlu1 %v1571_v28, %s3414_s20 }
 0x1e9   : > { %2113 = vperm.xlu0 %2540, %v2110_v29  }
 0x1ec   : > { %1947 = vrot.lane.b32.xlu1 %v1940_v30, %s3414_s20 }
 0x1ed   : > { %1927 = vrot.lane.b32.xlu0 %v1919_v31, %s3416_s1 }
 0x1f0   : > { %1576 = vrot.lane.b32.xlu1 %v1570_v33, %s3414_s20 }
 0x1f1   : > { %1949 = vrot.lane.b32.xlu0 %v1941_v34, %s3414_s20  ;;  %s3428_s20 = sshll.u32 %s3434_s24, 4 }
 0x1f4   : > { %1744 = vperm.xlu1 %2541, %v1741_v35  }
 0x216   : > { %v1615_v39 = vpop.permute.xlu1 %1614 }
 0x217   : > { %v2974_v41 = vpop.permute.xlu0 %1685 }
 0x21a   : > { %v2976_v42 = vpop.permute.xlu1 %1687 }
 0x21b   : > { %v2978_v50 = vpop.permute.xlu0 %1709 }
 0x21e   : > { %v1639_v52 = vpop.permute.xlu1 %1638 }
 0x21f   : > { %v1617_v53 = vpop.permute.xlu0 %1616 }
 0x220   : > { %v1625_v4 = vadd.f32 %v1617_v53, %v1598_v2  ;;  %v1619_v18 = vsel %vm987_vm4, %v1615_v39, %v1617_v53  ;;  %v1671_v2 = vmul.f32 %v2968_v36, %v2866_v20 }
 0x221   : > { %v1624_v25 = vadd.f32 %v1619_v18, %v1597_v22 }
 0x222   : > { %v2980_v58 = vpop.permute.xlu1 %1711 }
 0x223   : > { %v1690_v60 = vpop.permute.xlu0 %1689 }
 0x224   : > { %v1698_v18 = vadd.f32 %v1690_v60, %v1671_v2 }
 0x226   : > { %v1613_v61 = vpop.permute.xlu1 %1612 }
 0x227   : > { %v1618_v62 = vsel %vm987_vm4, %v1613_v61, %v1615_v39  ;;  %v2983_v1 = vpop.permute.xlu0 %2054 }
 0x228   : > { %v1623_v8 = vadd.f32 %v1618_v62, %v1596_v43  ;;  %v1692_v43 = vsel %vm987_vm4, %v2976_v42, %v1690_v60 }
 0x22a   : > { %v1637_v17 = vpop.permute.xlu1 %1636 }
 0x22b   : > { %v1642_v19 = vsel %vm1032_vm5, %v1637_v17, %v1639_v52  ;;  %v1641_v21 = vpop.permute.xlu0 %1640 }
 0x22c   : > { %v1647_v24 = vadd.f32 %v1642_v19, %v1623_v8  ;;  %v1649_v6 = vadd.f32 %v1641_v21, %v1625_v4  ;;  %v1643_v9 = vsel %vm1032_vm5, %v1639_v52, %v1641_v21  ;;  %v1965_v52 = vmul.f32 %v2970_v37, %v2878_v27 }
 0x22d   : > { %v1648_v29 = vadd.f32 %v1643_v9, %v1624_v25  ;;  %v1670_v8 = vmul.f32 %v2968_v36, %v2852_v56 }
 0x22e   : > { %v1984_v26 = vpop.permute.xlu1 %1983  ;;  %1653 = vrot.lane.b32.xlu1 %v1647_v24, %s3412_s19  ;;  %1657 = vrot.lane.b32.xlu0 %v1649_v6, %s3412_s19 }
 0x22f   : > { %v1714_v28 = vpop.permute.xlu0 %1713  ;;  %v1697_v21 = vadd.f32 %v1692_v43, %v1670_v8 }
 0x230   : > { %v1716_v19 = vsel %vm1032_vm5, %v2980_v58, %v1714_v28  ;;  %v1722_v24 = vadd.f32 %v1714_v28, %v1698_v18  ;;  %v1966_v28 = vmul.f32 %v2970_v37, %v2888_v32 }
 0x231   : > { %v1721_v25 = vadd.f32 %v1716_v19, %v1697_v21  ;;  %v1691_v21 = vsel %vm987_vm4, %v2974_v41, %v2976_v42 }
 0x232   : > { %v2057_v30 = vpop.permute.xlu1 %2056  ;;  %1655 = vrot.lane.b32.xlu1 %v1648_v29, %s3412_s19  ;;  %v1967_v29 = vmul.f32 %v2970_v37, %v2898_v3 }
 0x233   : > { %v1986_v31 = vpop.permute.xlu0 %1985 }
 0x234   : > { %v1988_v60 = vsel %vm987_vm4, %v1984_v26, %v1986_v31 }
 0x236   : > { %v2008_v33 = vpop.permute.xlu1 %2007 }
 0x237   : > { %v2059_v23 = vpop.permute.xlu0 %2058 }
 0x238   : > { %v2061_v2 = vsel %vm987_vm4, %v2057_v30, %v2059_v23 }
 0x23a   : > { %v2081_v34 = vpop.permute.xlu1 %2080 }
 0x23b   : > { %v2010_v53 = vpop.permute.xlu0 %2009 }
 0x23c   : > { %v2012_v43 = vsel %vm1032_vm5, %v2008_v33, %v2010_v53 }
 0x23e   : > { %v1982_v35 = vpop.permute.xlu1 %1981 }
 0x23f   : > { %v1987_v39 = vsel %vm987_vm4, %v1982_v35, %v1984_v26  ;;  %v2083_v20 = vpop.permute.xlu0 %2082  ;;  %v2039_v26 = vmul.f32 %v2972_v38, %v2888_v32 }
 0x240   : > { %v1992_v61 = vadd.f32 %v1987_v39, %v1965_v52 }
 0x241   : > { %v2066_v18 = vadd.f32 %v2061_v2, %v2039_v26 }
 0x242   : > { %v2006_v62 = vpop.permute.xlu1 %2005 }
 0x243   : > { %v2011_v4 = vsel %vm1032_vm5, %v2006_v62, %v2008_v33  ;;  %v2040_v62 = vmul.f32 %v2972_v38, %v2898_v3  ;;  %v2060_v3 = vsel %vm987_vm4, %v2983_v1, %v2057_v30  ;;  %v2038_v33 = vmul.f32 %v2972_v38, %v2878_v27 }
 0x244   : > { %v2016_v17 = vadd.f32 %v2011_v4, %v1992_v61  ;;  %v1994_v61 = vadd.f32 %v1986_v31, %v1967_v29  ;;  %v1993_v4 = vadd.f32 %v1988_v60, %v1966_v28  ;;  %v2085_v31 = vsel %vm1032_vm5, %v2081_v34, %v2083_v20  ;;  %v3063_v29 = vld [vmem:[%s3399_s7 + $0x8] sm:$0xf]  ;;  %v3068_v60 = vld [vmem:[%s3399_s7] sm:$0xff] }
 0x245   : > { %v2067_v37 = vadd.f32 %v2059_v23, %v2040_v62  ;;  %v1669_v23 = vmul.f32 %v2968_v36, %v2856_v59  ;;  %v1715_v1 = vsel %vm1032_vm5, %v2978_v50, %v2980_v58  ;;  %v2065_v38 = vadd.f32 %v2060_v3, %v2038_v33  ;;  %v752_v50 = vld [vmem:[%s3394_s2 + $0x8] sm:$0xf]  ;;  %v751_v58 = vld [vmem:[%s3394_s2] sm:$0xff] }
 0x246   : > { %v2537_v22 = vpop.permute.xlu1 %2536  ;;  %2022 = vrot.lane.b32.xlu0 %v2016_v17, %s3412_s19  ;;  %v2018_v8 = vadd.f32 %v2010_v53, %v1994_v61  ;;  %v2079_v17 = vpop.permute.xlu0 %2078  ;;  %v2017_v19 = vadd.f32 %v2012_v43, %v1993_v4  ;;  %v2090_v53 = vadd.f32 %v2085_v31, %v2066_v18 }
 0x247   : > { %v3007_v6 = vunpack.i.h.bf16 %v2537_v22  ;;  %v3009_v9 = vunpack.i.l.bf16 %v2537_v22  ;;  %v2091_v22 = vadd.f32 %v2083_v20, %v2067_v37 }
 0x249   : > { %v1725_v35 = vmul.f32 %v3007_v6, %v1722_v24  ;;  %v3017_v39 = vsel %vm1322_vm6, %v3009_v9, %v3007_v6  ;;  %v2084_v24 = vsel %vm1032_vm5, %v2079_v17, %v2081_v34  ;;  %v2094_v30 = vmul.f32 %v3007_v6, %v2091_v22 }
 0x24a   : > { %v1724_v52 = vmul.f32 %v1721_v25, %v3017_v39  ;;  %v1696_v25 = vadd.f32 %v1691_v21, %v1669_v23  ;;  %v2093_v41 = vmul.f32 %v2090_v53, %v3017_v39  ;;  %v2089_v42 = vadd.f32 %v2084_v24, %v2065_v38 }
 0x24b   : > { %1733 = vrot.lane.b32.xlu0 %v1725_v35, %s3418_s22 }
 0x24c   : > { %1731 = vrot.lane.b32.xlu1 %v1724_v52, %s3418_s22  ;;  %v1720_v20 = vadd.f32 %v1715_v1, %v1696_v25  ;;  %v2092_v36 = vmul.f32 %v3009_v9, %v2089_v42 }
 0x24e   : > { %v1723_v34 = vmul.f32 %v3009_v9, %v1720_v20 }
 0x24f   : > { %2026 = vrot.lane.b32.xlu0 %v2018_v8, %s3412_s19 }
 0x250   : > { %2024 = vrot.lane.b32.xlu1 %v2017_v19, %s3412_s19 }
 0x253   : > { %2102 = vrot.lane.b32.xlu0 %v2094_v30, %s3418_s22  ;;  %v3117_v30 = vsel %vm736_vm7, 1.0, %v2589_v0 }
 0x254   : > { %2100 = vrot.lane.b32.xlu1 %v2093_v41, %s3418_s22 }
 0x257   : > { %2098 = vrot.lane.b32.xlu0 %v2092_v36, %s3418_s22 }
 0x258   : > { %1729 = vrot.lane.b32.xlu1 %v1723_v34, %s3418_s22  ;;  %s3426_s22 = smov 127  }
 0x25b   : > { %760 = vperm.xlu0 %2540, %v752_v50  }
 0x25c   : > { %755 = vperm.xlu1 %2541, %v751_v58  }
 0x25f   : > { %2543 = vset.pattern.permute.xlu0 %v2592_v7 }
 0x260   : > { %2542 = vset.pattern.permute.xlu1 %v2592_v7  ;;  %1078 = vperm.xlu0 %2543, %v3063_v29   ;;  %v1538_v7 = vpop.permute.xlu0 %1537 }
 0x261   : > { %1074 = vperm.xlu1 %2542, %v3068_v60   ;;  %v1541_v17 = vmul.f32 %v1538_v7, %v2852_v56 }
 0x264   : > { %2545 = vset.pattern.permute.xlu0 %v2594_v11 }
 0x265   : > { %2544 = vset.pattern.permute.xlu1 %v2593_v10  ;;  %1122 = vperm.xlu0 %2545, %v3068_v60   ;;  %v1907_v10 = vpop.permute.xlu1 %1906 }
 0x266   : > { %1221 = vperm.xlu1 %2544, %v3068_v60   ;;  %v1910_v19 = vmul.f32 %v1907_v10, %v2888_v32  ;;  %v1909_v1 = vmul.f32 %v1907_v10, %v2878_v27  ;;  %v1540_v32 = vmul.f32 %v1538_v7, %v2856_v59  ;;  %v3129_v10 = vsel %vm735_vm11, 1.0, %v2589_v0 }
 0x269   : > { %2548 = vset.pattern.permute.xlu0 %v2597_v14 }
 0x26a   : > { %1225 = vperm.xlu1 %2544, %v3063_v29   ;;  %1273 = vperm.xlu0 %2548, %v3063_v29  }
 0x26e   : > { %2546 = vset.pattern.permute.xlu1 %v2594_v11  ;;  %2550 = vset.pattern.permute.xlu0 %v2598_v15  ;;  %v1559_v11 = vpop.permute.xlu0 %1558 }
 0x26f   : > { %1126 = vperm.xlu1 %2546, %v3063_v29   ;;  %1001 = vperm.xlu0 %2550, %v3068_v60  }
 0x273   : > { %2547 = vset.pattern.permute.xlu1 %v2597_v14  ;;  %2553 = vset.pattern.permute.xlu0 %v2599_v16  ;;  %v1924_v14 = vpop.permute.xlu0 %1923 }
 0x274   : > { %1269 = vperm.xlu1 %2547, %v3068_v60   ;;  %1058 = vperm.xlu0 %2553, %v3063_v29  }
 0x278   : > { %2549 = vset.pattern.permute.xlu1 %v2595_v12  ;;  %2555 = vset.pattern.permute.xlu0 %v2591_v5  ;;  %v1557_v12 = vpop.permute.xlu1 %1556 }
 0x279   : > { %956 = vperm.xlu1 %2549, %v3068_v60   ;;  %v1561_v31 = vsel %vm987_vm4, %v1557_v12, %v1559_v11 }
 0x27a   : > { %v1565_v33 = vadd.f32 %v1561_v31, %v1541_v17 }
 0x27c   : > { %v1926_v35 = vpop.permute.xlu1 %1925 }
 0x27d   : > { %960 = vperm.xlu1 %2549, %v3063_v29   ;;  %v1929_v23 = vsel %vm987_vm4, %v1924_v14, %v1926_v35 }
 0x27e   : > { %v1933_v25 = vadd.f32 %v1929_v23, %v1909_v1  ;;  %v2120_v23 = vld [vmem:[%s3405_s13] sm:$0xff] }
 0x280   : > { %v1555_v28 = vpop.permute.xlu1 %1554 }
 0x281   : > { %2551 = vset.pattern.permute.xlu1 %v2598_v15  ;;  %v1581_v15 = vpop.permute.xlu0 %1580  ;;  %v1560_v38 = vsel %vm987_vm4, %v1555_v28, %v1557_v12 }
 0x282   : > { %1005 = vperm.xlu1 %2551, %v3063_v29   ;;  %v1564_v20 = vadd.f32 %v1560_v38, %v1540_v32 }
 0x284   : > { %v1579_v61 = vpop.permute.xlu1 %1578 }
 0x285   : > { %v1946_v52 = vpop.permute.xlu0 %1945  ;;  %v1583_v3 = vsel %vm1032_vm5, %v1579_v61, %v1581_v15 }
 0x286   : > { %2552 = vset.pattern.permute.xlu1 %v2599_v16  ;;  %v1587_v53 = vadd.f32 %v1583_v3, %v1565_v33 }
 0x287   : > { %1054 = vperm.xlu1 %2552, %v3068_v60  }
 0x288   : > { %v1948_v16 = vpop.permute.xlu1 %1947  ;;  %v1589_v36 = vmul.f32 %v3117_v30, %v1587_v53  ;;  %v2121_v53 = vld [vmem:[%s3405_s13 + $0x8] sm:$0xf] }
 0x289   : > { %v3101_v62 = vpop.permute.xlu0 %2113  ;;  %v1951_v46 = vsel %vm1032_vm5, %v1946_v52, %v1948_v16 }
 0x28a   : > { %v1955_v50 = vadd.f32 %v1951_v46, %v1933_v25 }
 0x28b   : > { %2554 = vset.pattern.permute.xlu1 %v2596_v13 }
 0x28c   : > { %1201 = vperm.xlu1 %2554, %v3068_v60   ;;  %v1577_v43 = vpop.permute.xlu1 %1576  ;;  %v1957_v52 = vmul.f32 %v3129_v10, %v1955_v50 }
 0x28d   : > { %v1928_v2 = vpop.permute.xlu0 %1927  ;;  %v1582_v41 = vsel %vm1032_vm5, %v1577_v43, %v1579_v61 }
 0x28e   : > { %v1930_v18 = vsel %vm987_vm4, %v1926_v35, %v1928_v2  ;;  %v1586_v7 = vadd.f32 %v1582_v41, %v1564_v20 }
 0x28f   : > { %v1934_v24 = vadd.f32 %v1930_v18, %v1910_v19 }
 0x290   : > { %1205 = vperm.xlu1 %2554, %v3063_v29   ;;  %v3103_v13 = vpop.permute.xlu1 %1744 }
 0x291   : > { %v1950_v26 = vpop.permute.xlu0 %1949 }
 0x292   : > { %v1952_v21 = vsel %vm1032_vm5, %v1948_v16, %v1950_v26  ;;  %v1588_v16 = vmul.f32 %v3129_v10, %v1586_v7 }
 0x293   : > { %v1956_v57 = vadd.f32 %v1952_v21, %v1934_v24 }
 0x294   : > { %2556 = vset.pattern.permute.xlu1 %v2591_v5 }
 0x295   : > { %v1958_v40 = vmul.f32 %v3117_v30, %v1956_v57 }
 0x2a0   : > { %v1654_v4 = vpop.permute.xlu1 %1653  ;;  %v1658_v37 = vpop.permute.xlu0 %1657 }
 0x2a4   : > { %v1656_v5 = vpop.permute.xlu1 %1655 }
 0x2a5   : > { %v1660_v42 = vsel %vm1187_vm9, %v1656_v5, %v1658_v37  ;;  %v1659_v28 = vsel %vm1187_vm9, %v1654_v4, %v1656_v5 }
 0x2a6   : > { %v1664_v11 = vadd.f32 %v1660_v42, %v1589_v36  ;;  %v1663_v37 = vadd.f32 %v1659_v28, %v1588_v16 }
 0x2b8   : > { %v2023_v8 = vpop.permute.xlu0 %2022 }
 0x2bd   : > { %v1734_v22 = vpop.permute.xlu0 %1733 }
 0x2be   : > { %v1732_v56 = vpop.permute.xlu1 %1731 }
 0x2bf   : > { %v1736_v59 = vsel %vm1351_vm10, %v1732_v56, %v1734_v22 }
 0x2c0   : > { %v1740_v12 = vadd.f32 %v1736_v59, %v1664_v11 }
 0x2c1   : > { %v2027_v27 = vpop.permute.xlu0 %2026 }
 0x2c2   : > { %v2025_v34 = vpop.permute.xlu1 %2024  ;;  %v1748_v31 = vadd.f32 %v3103_v13, %v1740_v12 }
 0x2c3   : > { %v2029_v58 = vsel %vm1187_vm9, %v2025_v34, %v2027_v27  ;;  %v2028_v14 = vsel %vm1187_vm9, %v2023_v8, %v2025_v34 }
 0x2c4   : > { %v2033_v35 = vadd.f32 %v2029_v58, %v1958_v40  ;;  %v2032_v43 = vadd.f32 %v2028_v14, %v1957_v52 }
 0x2c5   : > { %v2103_v55 = vpop.permute.xlu0 %2102 }
 0x2c6   : > { %v2101_v15 = vpop.permute.xlu1 %2100 }
 0x2c7   : > { %v2105_v61 = vsel %vm1351_vm10, %v2101_v15, %v2103_v55 }
 0x2c8   : > { %v2109_v2 = vadd.f32 %v2105_v61, %v2033_v35 }
 0x2c9   : > { %v2099_v26 = vpop.permute.xlu0 %2098 }
 0x2ca   : > { %v2117_v17 = vadd.f32 %v3101_v62, %v2109_v2  ;;  %v2104_v8 = vsel %vm1351_vm10, %v2099_v26, %v2101_v15  ;;  %v1730_v3 = vpop.permute.xlu1 %1729 }
 0x2cb   : > { %v2108_v18 = vadd.f32 %v2104_v8, %v2032_v43  ;;  %v1735_v4 = vsel %vm1351_vm10, %v1730_v3, %v1732_v56 }
 0x2cc   : > { %v2119_v5 = vmul.f32 %v2117_v17, %v1748_v31  ;;  %v1739_v19 = vadd.f32 %v1735_v4, %v1663_v37 }
 0x2cd   : > { %v2116_v33 = vadd.f32 %v3101_v62, %v2108_v18 }
 0x2ce   : > { %v1747_v21 = vadd.f32 %v3103_v13, %v1739_v19  ;;  %2439 = vmatprep.subr.msk.mxu1 %vm617_vm8, %v2119_v5 }
 0x2d0   : > { %v2118_v22 = vmul.f32 %v2116_v33, %v1747_v21 }
 0x2d2   : > { %2440 = vmatpush1.msk.msra.mxu1 %vm617_vm8, %v2118_v22  ;;  %vm2606_vm8 = vmmov 1  }
 0x2d3   : > { %2441 = vmatmul.mubr.msk.f32.vlgmr.msra.gmra.mrb[6].mxu1 %vm763_vm2, %v2120_v23 }
 0x2d4   : > { %2216 = vmatprep.mubr.f32.mxu1 %v2589_v0 }
 0x2d7   : > { %2442 = vmatmul.mubr.msk.f32.gmra.mrb[8].mxu1 %vm763_vm2, %v2121_v53  ;;  %vm2238_vm2 = vcmask 1043456  }
 0x2d8   : > { %vm2473_vm12 = vmpackc.low %vm2238_vm2, %vm2606_vm8 }
 0x2da   : > { %v761_v62 = vpop.permute.xlu0 %760 }
 0x2db   : > { %v756_v13 = vpop.permute.xlu1 %755  ;;  %v928_v56 = vadd.f32 %v2837_v44, %v761_v62  ;;  %v3168_v41 = vadd.f32 %v2850_v54, %v761_v62 }
 0x2dc   : > { %v923_v24 = vadd.f32 %v2839_v45, %v756_v13  ;;  %v3160_v38 = vadd.f32 %v2844_v48, %v756_v13  ;;  %v846_v27 = vadd.f32 %v2842_v47, %v756_v13  ;;  %v1364_v13 = vld [vmem:[%s3400_s8] sm:$0xff] }
 0x2dd   : > { %v3163_v0 = vmul.f32 %v928_v56, %v2859_v63  ;;  %v2122_v56 = vld [vmem:[%s3406_s14] sm:$0xff] }
 0x2de   : > { %v3157_v1 = vmul.f32 %v923_v24, %v2859_v63  ;;  %v852_v63 = vadd.f32 %v2848_v51, %v761_v62  ;;  %v3187_v50 = vmul.f32 %v846_v27, %v2846_v49  ;;  %v1365_v24 = vld [vmem:[%s3400_s8 + $0x8] sm:$0xf] }
 0x2df   : > { %v1079_v25 = vpop.permute.xlu0 %1078 }
 0x2e0   : > { %v1075_v32 = vpop.permute.xlu1 %1074  ;;  %v1085_v44 = vmul.f32 %v1079_v25, %v3168_v41  ;;  %v1086_v45 = vmul.f32 %v1079_v25, %v3163_v0  ;;  %v3183_v36 = vmul.f32 %v852_v63, %v2846_v49 }
 0x2e1   : > { %v1082_v46 = vmul.f32 %v1075_v32, %v3160_v38  ;;  %v1083_v57 = vmul.f32 %v1075_v32, %v3157_v1  ;;  %v1081_v59 = vmul.f32 %v1075_v32, %v3187_v50  ;;  %v2123_v32 = vld [vmem:[%s3406_s14 + $0x8] sm:$0xf] }
 0x2e2   : > { %v1084_v47 = vmul.f32 %v1079_v25, %v3183_v36 }
 0x2e3   : > { %1097 = vrot.lane.b32.xlu1 %v1083_v57, %s3424_s23  ;;  %1095 = vrot.lane.b32.xlu0 %v1082_v46, %s3424_s23 }
 0x2e4   : > { %v1123_v7 = vpop.permute.xlu0 %1122 }
 0x2e5   : > { %v1222_v48 = vpop.permute.xlu1 %1221  ;;  %v1131_v40 = vmul.f32 %v1123_v7, %v3157_v1  ;;  %v1130_v55 = vmul.f32 %v1123_v7, %v3160_v38  ;;  %v1129_v43 = vmul.f32 %v1123_v7, %v3187_v50 }
 0x2e6   : > { %v1229_v42 = vmul.f32 %v1222_v48, %v3160_v38  ;;  %v1230_v54 = vmul.f32 %v1222_v48, %v3157_v1  ;;  %v1228_v49 = vmul.f32 %v1222_v48, %v3187_v50 }
 0x2e7   : > { %1103 = vrot.lane.b32.xlu1 %v1086_v45, %s3424_s23  ;;  %1101 = vrot.lane.b32.xlu0 %v1085_v44, %s3424_s23 }
 0x2e9   : > { %v1226_v20 = vpop.permute.xlu1 %1225  ;;  %v1274_v28 = vpop.permute.xlu0 %1273 }
 0x2ea   : > { %v1233_v34 = vmul.f32 %v1226_v20, %v3163_v0  ;;  %v1232_v51 = vmul.f32 %v1226_v20, %v3168_v41  ;;  %v1231_v58 = vmul.f32 %v1226_v20, %v3183_v36  ;;  %v1281_v61 = vmul.f32 %v1274_v28, %v3163_v0 }
 0x2eb   : > { %1244 = vrot.lane.b32.xlu1 %v1230_v54, %s3424_s23  ;;  %1242 = vrot.lane.b32.xlu0 %v1229_v42, %s3424_s23  ;;  %v1280_v16 = vmul.f32 %v1274_v28, %v3168_v41  ;;  %v1279_v26 = vmul.f32 %v1274_v28, %v3183_v36 }
 0x2ee   : > { %v1127_v11 = vpop.permute.xlu1 %1126 }
 0x2ef   : > { %1250 = vrot.lane.b32.xlu1 %v1233_v34, %s3424_s23  ;;  %1248 = vrot.lane.b32.xlu0 %v1232_v51, %s3424_s23  ;;  %v1134_v12 = vmul.f32 %v1127_v11, %v3163_v0  ;;  %v1133_v14 = vmul.f32 %v1127_v11, %v3168_v41  ;;  %v1132_v2 = vmul.f32 %v1127_v11, %v3183_v36 }
 0x2f3   : > { %1099 = vrot.lane.b32.xlu1 %v1084_v47, %s3424_s23  ;;  %1093 = vrot.lane.b32.xlu0 %v1081_v59, %s3424_s23  ;;  %v1270_v35 = vpop.permute.xlu1 %1269 }
 0x2f4   : > { %v1278_v15 = vmul.f32 %v1270_v35, %v3157_v1  ;;  %v1277_v52 = vmul.f32 %v1270_v35, %v3160_v38  ;;  %v1276_v37 = vmul.f32 %v1270_v35, %v3187_v50 }
 0x2f7   : > { %1246 = vrot.lane.b32.xlu1 %v1231_v58, %s3424_s23  ;;  %1240 = vrot.lane.b32.xlu0 %v1228_v49, %s3424_s23 }
 0x2f8   : > { %v957_v31 = vpop.permute.xlu1 %956 }
 0x2f9   : > { %v964_v17 = vmul.f32 %v957_v31, %v3160_v38  ;;  %v965_v8 = vmul.f32 %v957_v31, %v3157_v1 }
 0x2fb   : > { %1145 = vrot.lane.b32.xlu1 %v1131_v40, %s3425_s29  ;;  %1143 = vrot.lane.b32.xlu0 %v1130_v55, %s3425_s29 }
 0x2fc   : > { %v961_v3 = vpop.permute.xlu1 %960 }
 0x2fd   : > { %v967_v18 = vmul.f32 %v961_v3, %v3168_v41  ;;  %v968_v4 = vmul.f32 %v961_v3, %v3163_v0  ;;  %v966_v5 = vmul.f32 %v961_v3, %v3183_v36 }
 0x2ff   : > { %1151 = vrot.lane.b32.xlu1 %v1134_v12, %s3425_s29  ;;  %1149 = vrot.lane.b32.xlu0 %v1133_v14, %s3425_s29 }
 0x301   : > { %v1006_v21 = vpop.permute.xlu1 %1005 }
 0x302   : > { %v1012_v22 = vmul.f32 %v1006_v21, %v3168_v41  ;;  %v1013_v23 = vmul.f32 %v1006_v21, %v3163_v0  ;;  %v1011_v62 = vmul.f32 %v1006_v21, %v3183_v36 }
 0x303   : > { %1292 = vrot.lane.b32.xlu1 %v1278_v15, %s3425_s29  ;;  %1290 = vrot.lane.b32.xlu0 %v1277_v52, %s3425_s29 }
 0x306   : > { %v1055_v46 = vpop.permute.xlu1 %1054 }
 0x307   : > { %1298 = vrot.lane.b32.xlu1 %v1281_v61, %s3425_s29  ;;  %1296 = vrot.lane.b32.xlu0 %v1280_v16, %s3425_s29  ;;  %v1063_v58 = vmul.f32 %v1055_v46, %v3157_v1  ;;  %v1062_v11 = vmul.f32 %v1055_v46, %v3160_v38 }
 0x30b   : > { %1147 = vrot.lane.b32.xlu1 %v1132_v2, %s3425_s29  ;;  %1141 = vrot.lane.b32.xlu0 %v1129_v43, %s3425_s29  ;;  %v3262_v57 = vpop.permute.xlu1 %1201 }
 0x30f   : > { %1294 = vrot.lane.b32.xlu1 %v1279_v26, %s3425_s29  ;;  %1288 = vrot.lane.b32.xlu0 %v1276_v37, %s3425_s29  ;;  %v3264_v44 = vpop.permute.xlu1 %1205 }
 0x313   : > { %944 = vperm.xlu1 %2556, %v3063_v29   ;;  %939 = vperm.xlu0 %2555, %v3068_v60   ;;  %v963_v29 = vmul.f32 %v957_v31, %v3187_v50  ;;  %v1002_v60 = vpop.permute.xlu0 %1001 }
 0x314   : > { %v1009_v19 = vmul.f32 %v1002_v60, %v3160_v38  ;;  %v1010_v33 = vmul.f32 %v1002_v60, %v3157_v1  ;;  %v1008_v53 = vmul.f32 %v1002_v60, %v3187_v50 }
 0x317   : > { %977 = vrot.lane.b32.xlu1 %v964_v17, %s3424_s23  ;;  %979 = vrot.lane.b32.xlu0 %v965_v8, %s3424_s23  ;;  %v1059_v25 = vpop.permute.xlu0 %1058 }
 0x318   : > { %v1066_v12 = vmul.f32 %v1059_v25, %v3163_v0  ;;  %v1065_v61 = vmul.f32 %v1059_v25, %v3168_v41 }
 0x31b   : > { %983 = vrot.lane.b32.xlu1 %v967_v18, %s3424_s23  ;;  %985 = vrot.lane.b32.xlu0 %v968_v4, %s3424_s23 }
 0x31f   : > { %975 = vrot.lane.b32.xlu1 %v963_v29, %s3424_s23  ;;  %981 = vrot.lane.b32.xlu0 %v966_v5, %s3424_s23  ;;  %v1064_v5 = vmul.f32 %v1059_v25, %v3183_v36 }
 0x323   : > { %1022 = vrot.lane.b32.xlu1 %v1009_v19, %s3425_s29  ;;  %1024 = vrot.lane.b32.xlu0 %v1010_v33, %s3425_s29  ;;  %v1210_v19 = vmul.f32 %v3262_v57, %v3157_v1 }
 0x327   : > { %1028 = vrot.lane.b32.xlu1 %v1012_v22, %s3425_s29  ;;  %1030 = vrot.lane.b32.xlu0 %v1013_v23, %s3425_s29  ;;  %v1061_v22 = vmul.f32 %v1055_v46, %v3187_v50  ;;  %v1209_v23 = vmul.f32 %v3262_v57, %v3160_v38 }
 0x32b   : > { %1020 = vrot.lane.b32.xlu1 %v1008_v53, %s3425_s29  ;;  %1026 = vrot.lane.b32.xlu0 %v1011_v62, %s3425_s29  ;;  %s3427_s29 = smov 126  }
 0x32f   : > { %1368 = vperm.xlu1 %2556, %v1364_v13   ;;  %1373 = vperm.xlu0 %2555, %v1365_v24  }
 0x333   : > { %2126 = vperm.xlu1 %2556, %v2122_v56   ;;  %2131 = vperm.xlu0 %2555, %v2123_v32   ;;  %v1213_v56 = vmul.f32 %v3264_v44, %v3163_v0 }
 0x355   : > { %v1098_v45 = vpop.permute.xlu1 %1097  ;;  %v1096_v48 = vpop.permute.xlu0 %1095 }
 0x356   : > { %v1106_v49 = vsel %vm987_vm4, %v1096_v48, %v1098_v45  ;;  %v1117_v40 = vadd.f32 %v1098_v45, %v1063_v58 }
 0x357   : > { %v1116_v14 = vadd.f32 %v1106_v49, %v1062_v11 }
 0x359   : > { %v1104_v63 = vpop.permute.xlu1 %1103  ;;  %v1102_v42 = vpop.permute.xlu0 %1101 }
 0x35a   : > { %v1108_v28 = vsel %vm987_vm4, %v1102_v42, %v1104_v63  ;;  %v1120_v16 = vadd.f32 %v1104_v63, %v1066_v12  ;;  %v1211_v12 = vmul.f32 %v3264_v44, %v3183_v36 }
 0x35b   : > { %v1119_v26 = vadd.f32 %v1108_v28, %v1065_v61 }
 0x35d   : > { %v1245_v54 = vpop.permute.xlu1 %1244  ;;  %v3266_v27 = vpop.permute.xlu0 %1242 }
 0x35e   : > { %v1253_v33 = vsel %vm987_vm4, %v3266_v27, %v1245_v54  ;;  %v1264_v53 = vadd.f32 %v1245_v54, %v1210_v19  ;;  %v1212_v54 = vmul.f32 %v3264_v44, %v3168_v41 }
 0x35f   : > { %v1263_v32 = vadd.f32 %v1253_v33, %v1209_v23 }
 0x361   : > { %v1251_v20 = vpop.permute.xlu1 %1250  ;;  %v1249_v34 = vpop.permute.xlu0 %1248 }
 0x362   : > { %v1267_v58 = vadd.f32 %v1251_v20, %v1213_v56 }
 0x365   : > { %v1100_v51 = vpop.permute.xlu1 %1099  ;;  %v1094_v47 = vpop.permute.xlu0 %1093 }
 0x366   : > { %v1107_v29 = vsel %vm987_vm4, %v1100_v51, %v1102_v42  ;;  %v1105_v21 = vsel %vm987_vm4, %v1094_v47, %v1096_v48  ;;  %v1255_v48 = vsel %vm987_vm4, %v1249_v34, %v1251_v20 }
 0x367   : > { %v1118_v62 = vadd.f32 %v1107_v29, %v1064_v5  ;;  %v1115_v1 = vadd.f32 %v1105_v21, %v1061_v22  ;;  %v1266_v11 = vadd.f32 %v1255_v48, %v1212_v54 }
 0x369   : > { %v1247_v59 = vpop.permute.xlu1 %1246  ;;  %v1241_v7 = vpop.permute.xlu0 %1240 }
 0x36d   : > { %v1146_v55 = vpop.permute.xlu1 %1145  ;;  %v1144_v15 = vpop.permute.xlu0 %1143 }
 0x36e   : > { %v1165_v35 = vadd.f32 %v1146_v55, %v1117_v40  ;;  %v1154_v52 = vsel %vm1032_vm5, %v1144_v15, %v1146_v55  ;;  %v1254_v40 = vsel %vm987_vm4, %v1247_v59, %v1249_v34 }
 0x36f   : > { %v1164_v2 = vadd.f32 %v1154_v52, %v1116_v14  ;;  %v1252_v14 = vsel %vm987_vm4, %v1241_v7, %v3266_v27  ;;  %v1265_v59 = vadd.f32 %v1254_v40, %v1211_v12 }
 0x370   : > { %1179 = vrot.lane.b32.xlu0 %v1165_v35, %s3426_s22 }
 0x371   : > { %v1152_v43 = vpop.permute.xlu1 %1151  ;;  %1177 = vrot.lane.b32.xlu1 %v1164_v2, %s3426_s22  ;;  %v1150_v31 = vpop.permute.xlu0 %1149 }
 0x372   : > { %v1168_v37 = vadd.f32 %v1152_v43, %v1120_v16  ;;  %v1156_v17 = vsel %vm1032_vm5, %v1150_v31, %v1152_v43 }
 0x373   : > { %v1167_v8 = vadd.f32 %v1156_v17, %v1119_v26 }
 0x374   : > { %1185 = vrot.lane.b32.xlu0 %v1168_v37, %s3426_s22 }
 0x375   : > { %v1293_v3 = vpop.permute.xlu1 %1292  ;;  %1183 = vrot.lane.b32.xlu1 %v1167_v8, %s3426_s22  ;;  %v1291_v18 = vpop.permute.xlu0 %1290 }
 0x376   : > { %v1301_v13 = vsel %vm1032_vm5, %v1291_v18, %v1293_v3  ;;  %v1312_v63 = vadd.f32 %v1293_v3, %v1264_v53 }
 0x377   : > { %v1311_v51 = vadd.f32 %v1301_v13, %v1263_v32 }
 0x378   : > { %v1329_v35 = vmul.f32 %v3007_v6, %v1312_v63 }
 0x379   : > { %v1299_v4 = vpop.permute.xlu1 %1298  ;;  %v1297_v60 = vpop.permute.xlu0 %1296  ;;  %v1328_v28 = vmul.f32 %v3017_v39, %v1311_v51 }
 0x37a   : > { %v1303_v49 = vsel %vm1032_vm5, %v1297_v60, %v1299_v4  ;;  %v1315_v20 = vadd.f32 %v1299_v4, %v1267_v58 }
 0x37b   : > { %v1314_v52 = vadd.f32 %v1303_v49, %v1266_v11 }
 0x37c   : > { %v1332_v27 = vmul.f32 %v3007_v6, %v1315_v20  ;;  %v2228_v6 = vld [vmem:[%s3408_s16] sm:$0x3f] }
 0x37d   : > { %v1148_v24 = vpop.permute.xlu1 %1147  ;;  %v1142_v45 = vpop.permute.xlu0 %1141  ;;  %v1331_v16 = vmul.f32 %v3017_v39, %v1314_v52 }
 0x37e   : > { %v1155_v25 = vsel %vm1032_vm5, %v1148_v24, %v1150_v31  ;;  %v1153_v42 = vsel %vm1032_vm5, %v1142_v45, %v1144_v15  ;;  %v1208_v15 = vmul.f32 %v3262_v57, %v3187_v50 }
 0x37f   : > { %v1166_v46 = vadd.f32 %v1155_v25, %v1118_v62  ;;  %v1163_v47 = vadd.f32 %v1153_v42, %v1115_v1 }
 0x380   : > { %v1262_v44 = vadd.f32 %v1252_v14, %v1208_v15 }
 0x381   : > { %v1295_v0 = vpop.permute.xlu1 %1294  ;;  %1181 = vrot.lane.b32.xlu0 %v1166_v46, %s3426_s22  ;;  %1175 = vrot.lane.b32.xlu1 %v1163_v47, %s3426_s22  ;;  %v1289_v55 = vpop.permute.xlu0 %1288  ;;  %s586_s22 = scalar_lea.vmem %s3409_s17, %s3428_s20 }
 0x382   : > { %v1302_v34 = vsel %vm1032_vm5, %v1295_v0, %v1297_v60  ;;  %v1300_v61 = vsel %vm1032_vm5, %v1289_v55, %v1291_v18 }
 0x383   : > { %v1313_v7 = vadd.f32 %v1302_v34, %v1265_v59  ;;  %v1310_v2 = vadd.f32 %v1300_v61, %v1262_v44 }
 0x385   : > { %1343 = vrot.lane.b32.xlu0 %v1329_v35, %s3427_s29  ;;  %1341 = vrot.lane.b32.xlu1 %v1328_v28, %s3427_s29  ;;  %v1330_v57 = vmul.f32 %v3009_v9, %v1313_v7  ;;  %v1327_v43 = vmul.f32 %v3009_v9, %v1310_v2 }
 0x389   : > { %1349 = vrot.lane.b32.xlu0 %v1332_v27, %s3427_s29  ;;  %1347 = vrot.lane.b32.xlu1 %v1331_v16, %s3427_s29 }
 0x38d   : > { %1345 = vrot.lane.b32.xlu0 %v1330_v57, %s3427_s29  ;;  %1339 = vrot.lane.b32.xlu1 %v1327_v43, %s3427_s29 }
 0x391   : > { %2231 = vperm.xlu1 %2556, %v2228_v6  }
 0x392   : > { %v940_v17 = vpop.permute.xlu0 %939  ;;  %v945_v8 = vpop.permute.xlu1 %944 }
 0x393   : > { %v948_v25 = vmul.f32 %v940_v17, %v3160_v38  ;;  %v950_v54 = vmul.f32 %v945_v8, %v3168_v41  ;;  %v949_v40 = vmul.f32 %v945_v8, %v3183_v36  ;;  %v947_v12 = vmul.f32 %v940_v17, %v3187_v50 }
 0x396   : > { %v980_v9 = vpop.permute.xlu0 %979  ;;  %v978_v3 = vpop.permute.xlu1 %977 }
 0x397   : > { %v989_v1 = vsel %vm987_vm4, %v978_v3, %v980_v9 }
 0x398   : > { %v997_v63 = vadd.f32 %v989_v1, %v948_v25 }
 0x39a   : > { %v986_v18 = vpop.permute.xlu0 %985  ;;  %v984_v4 = vpop.permute.xlu1 %983 }
 0x39b   : > { %v991_v42 = vsel %vm987_vm4, %v984_v4, %v986_v18 }
 0x39c   : > { %v999_v49 = vadd.f32 %v991_v42, %v950_v54 }
 0x39e   : > { %v982_v29 = vpop.permute.xlu0 %981  ;;  %v976_v60 = vpop.permute.xlu1 %975 }
 0x39f   : > { %v990_v0 = vsel %vm987_vm4, %v982_v29, %v984_v4  ;;  %v988_v38 = vsel %vm987_vm4, %v976_v60, %v978_v3 }
 0x3a0   : > { %v998_v20 = vadd.f32 %v990_v0, %v949_v40  ;;  %v996_v52 = vadd.f32 %v988_v38, %v947_v12 }
 0x3a2   : > { %v1025_v5 = vpop.permute.xlu0 %1024  ;;  %v1023_v19 = vpop.permute.xlu1 %1022 }
 0x3a3   : > { %v1034_v45 = vsel %vm1032_vm5, %v1023_v19, %v1025_v5 }
 0x3a4   : > { %v1042_v51 = vadd.f32 %v1034_v45, %v997_v63 }
 0x3a6   : > { %v3325_v26 = vpop.f32.mrb[6].mxu1  ;;  %v1031_v33 = vpop.permute.xlu0 %1030  ;;  %v1046_v41 = vmul.f32 %v3117_v30, %v1042_v51  ;;  %v2564_v51 = vld [vmem:[%s2726_s18 + $0x8] sm:$0x3f] }
 0x3a7   : > { %v3327_v39 = vpop.f32.mrb[7].mxu1  ;;  %v1029_v21 = vpop.permute.xlu1 %1028 }
 0x3a8   : > { %v1036_v47 = vsel %vm1032_vm5, %v1029_v21, %v1031_v33 }
 0x3a9   : > { %v1044_v14 = vadd.f32 %v1036_v47, %v999_v49 }
 0x3aa   : > { %v3329_v37 = vpop.f32.mrb[8].mxu1  ;;  %v1027_v22 = vpop.permute.xlu0 %1026 }
 0x3ab   : > { %v3331_v31 = vpop.f32.mrb[9].mxu1  ;;  %v1021_v23 = vpop.permute.xlu1 %1020  ;;  %v1035_v35 = vsel %vm1032_vm5, %v1027_v22, %v1029_v21  ;;  %v1048_v50 = vmul.f32 %v3117_v30, %v1044_v14 }
 0x3ac   : > { %v1033_v15 = vsel %vm1032_vm5, %v1021_v23, %v1023_v19  ;;  %v1043_v61 = vadd.f32 %v1035_v35, %v998_v20 }
 0x3ad   : > { %v1041_v27 = vadd.f32 %v1033_v15, %v996_v52 }
 0x3ae   : > { %v3333_v53 = vpop.permute.xlu0 %1373  ;;  %v1047_v17 = vmul.f32 %v3129_v10, %v1043_v61 }
 0x3af   : > { %v3335_v62 = vpop.permute.xlu1 %1368  ;;  %v1045_v9 = vmul.f32 %v3129_v10, %v1041_v27 }
 0x3b2   : > { %v2132_v13 = vpop.permute.xlu0 %2131 }
 0x3b3   : > { %v3337_v24 = vpop.permute.xlu1 %2126  ;;  %v2221_v60 = vadd.f32 %v3331_v31, %v2132_v13  ;;  %v2219_v1 = vadd.f32 %v3329_v37, %v2132_v13  ;;  %v2223_v37 = vld [vmem:[%s3407_s15] sm:$0x3f] }
 0x3b4   : > { %v2215_v30 = vadd.f32 %v3327_v39, %v3337_v24  ;;  %v2213_v31 = vadd.f32 %v3325_v26, %v3337_v24  ;;  %v2563_v24 = vld [vmem:[%s2726_s18] sm:$0x3f] }
 0x3e2   : > { %v1180_v56 = vpop.permute.xlu0 %1179 }
 0x3e3   : > { %v1178_v32 = vpop.permute.xlu1 %1177 }
 0x3e4   : > { %v1189_v55 = vsel %vm1187_vm9, %v1178_v32, %v1180_v56 }
 0x3e5   : > { %v1197_v34 = vadd.f32 %v1189_v55, %v1046_v41 }
 0x3e6   : > { %v1186_v48 = vpop.permute.xlu0 %1185 }
 0x3e7   : > { %v1184_v46 = vpop.permute.xlu1 %1183 }
 0x3e8   : > { %v1191_v36 = vsel %vm1187_vm9, %v1184_v46, %v1186_v48 }
 0x3e9   : > { %v1199_v2 = vadd.f32 %v1191_v36, %v1048_v50 }
 0x3f3   : > { %v1182_v58 = vpop.permute.xlu0 %1181  ;;  %v1176_v11 = vpop.permute.xlu1 %1175 }
 0x3f4   : > { %v1190_v57 = vsel %vm1187_vm9, %v1182_v58, %v1184_v46  ;;  %v1188_v6 = vsel %vm1187_vm9, %v1176_v11, %v1178_v32 }
 0x3f5   : > { %v1198_v4 = vadd.f32 %v1190_v57, %v1047_v17  ;;  %v1196_v5 = vadd.f32 %v1188_v6, %v1045_v9 }
 0x3f7   : > { %v1344_v28 = vpop.permute.xlu0 %1343  ;;  %v1342_v59 = vpop.permute.xlu1 %1341 }
 0x3f8   : > { %v1353_v44 = vsel %vm1351_vm10, %v1342_v59, %v1344_v28 }
 0x3f9   : > { %v1361_v7 = vadd.f32 %v1353_v44, %v1197_v34 }
 0x3fb   : > { %v1350_v16 = vpop.permute.xlu0 %1349  ;;  %v1348_v43 = vpop.permute.xlu1 %1347  ;;  %v1377_v3 = vadd.f32 %v3335_v62, %v1361_v7 }
 0x3fc   : > { %v1355_v8 = vsel %vm1351_vm10, %v1348_v43, %v1350_v16 }
 0x3fd   : > { %v1363_v18 = vadd.f32 %v1355_v8, %v1199_v2  ;;  %v2225_v23 = vmul.f32 %v2215_v30, %v1377_v3 }
 0x3ff   : > { %v1346_v29 = vpop.permute.xlu0 %1345  ;;  %v1379_v19 = vadd.f32 %v3333_v53, %v1363_v18  ;;  %v1340_v33 = vpop.permute.xlu1 %1339 }
 0x400   : > { %v1354_v21 = vsel %vm1351_vm10, %v1346_v29, %v1348_v43  ;;  %v1352_v22 = vsel %vm1351_vm10, %v1340_v33, %v1342_v59 }
 0x401   : > { %v1362_v10 = vadd.f32 %v1354_v21, %v1198_v4  ;;  %v2227_v56 = vmul.f32 %v2221_v60, %v1379_v19  ;;  %v1360_v32 = vadd.f32 %v1352_v22, %v1196_v5 }
 0x403   : > { %v1378_v39 = vadd.f32 %v3333_v53, %v1362_v10  ;;  %v1376_v25 = vadd.f32 %v3335_v62, %v1360_v32  ;;  %v2472_v45 = vpack.c.bf16 %v2227_v56, %v2225_v23 }
 0x405   : > { %v2226_v48 = vmul.f32 %v2219_v1, %v1378_v39  ;;  %v2224_v63 = vmul.f32 %v2213_v31, %v1376_v25  ;;  %2474 = vmatprep.subr.msk.bf16.mxu0 %vm2473_vm12, %v2472_v45 }
 0x407   : > { %v2475_v46 = vpack.c.bf16 %v2226_v48, %v2224_v63 }
 0x409   : > { %2477 = vmatpush1.bf16.msk.msra.mxu0 %vm2473_vm12, %v2475_v46 }
 0x40c   : > { %2445 = vmatmul.mubr.msk.f32.vlgmr.msra.gmra.mrb[8].mxu0 %vm2234_vm13, %v2223_v37 }
 0x410   : > { %v2232_v53 = vpop.permute.xlu1 %2231 }
 0x4df   : > { %v2311_v13 = vpop.f32.mrb[8].mxu0 }
 0x4e0   : > { %v2312_v42 = vadd.f32 %v2311_v13, %v2232_v53  ;;  %v2313_v26 = vpop.f32.mrb[9].mxu0 }
 0x4e1   : > { %v2314_v62 = vadd.f32 %v2313_v26, %v2232_v53 }
 0x4e2   : > { %v2316_v54 = vadd.f32 %v2563_v24, %v2312_v42 }
 0x4e3   : > { %v2317_v47 = vadd.f32 %v2564_v51, %v2314_v62 }
 0x4e4   : > { %2318 = vst [vmem:[%s586_s22] sm:$0x3f] %v2316_v54 }
 0x4e5   : > { %2319 = vst [vmem:[%s586_s22 + $0x8] sm:$0x3f] %v2317_v47 }
 0x4e6 PF: > { %s27_s26 = sadd.s32 1, %s2587_s26   ;;  %s3429_s24 = smov %s2583_s25 }
 0x4e7   : > { %p24_p5 = scmp.ge.s32.totalorder %s27_s26, 4   ;;  %s3430_s25 = smov %s3432_s27 }
 0x4e9   :  { %26 = sbr.rel (!%p24_p5) target bundleno = 3 (0x3), region = 118 }

</bundles_post_ra>
